<compile_context>
chip_gen: v5e
topology: v5e:2x2
jax: 0.10.0
libtpu: 0.0.40
codegen_flags: <defaults>
</compile_context>

<pallas_src>
import functools

import jax
import jax.numpy as jnp
from jax.experimental import pallas as pl
from jax.experimental.pallas import tpu as pltpu


# -----------------------------------------------------------------------------
# Kernel: one (batch, row-tile) per grid step
# -----------------------------------------------------------------------------
def _sepconv_kernel(x_ref, top_ref, bot_ref, wdw_ref, wpw_ref, b_ref, out_ref,
                    *, H, W, C_in, C_out, stride, TH, TH_in, num_tiles,
                    use_mxu, flatten_out):
    """
    x_ref   : (1, TH_in, W, C_in)  rows [t*TH_in, (t+1)*TH_in) of the unpadded NHWC input
    top_ref : (1, 1, W, C_in)      input row t*TH_in - 1  (index clamped; zeroed at top edge)
    bot_ref : (1, 1, W, C_in)      input row (t+1)*TH_in  (index clamped; zeroed at bottom edge)
    wdw_ref : (3, 3, C_in)         depthwise 3x3 weights (channel multiplier 1)
    wpw_ref : (C_in, C_out)        pointwise weights with BN scale folded in
    b_ref   : (1, C_out)           fully folded bias (dw bias + pw bias + BN)
    out_ref : (1, TH, W_out*C_out) if flatten_out else (1, TH, W_out, C_out)
    """
    t = pl.program_id(1)
    W_out = (W + 2 - 3) // stride + 1

    x_main = x_ref[0].astype(jnp.float32)      # (TH_in, W, C_in)
    top = top_ref[0].astype(jnp.float32)       # (1, W, C_in)
    bot = bot_ref[0].astype(jnp.float32)       # (1, W, C_in)

    # Zero the halo rows that fall outside the image (padding=1 semantics). The
    # BlockSpec index maps were clamped so the DMA itself always stays in bounds.
    top = jnp.where(t == 0, jnp.zeros_like(top), top)
    bot_valid = (t + 1) * TH_in < H
    bot = jnp.where(bot_valid, bot, jnp.zeros_like(bot))
    if num_tiles * TH_in > H:
        # Last row tile overhangs the input (possible for stride>1 with odd H):
        # mask the out-of-range rows of the partial block to zero.
        row_ids = t * TH_in + jax.lax.broadcasted_iota(jnp.int32, (TH_in, 1, 1), 0)
        x_main = jnp.where(row_ids < H, x_main, jnp.zeros_like(x_main))

    # Assemble the spatially padded tile entirely in VMEM (no HBM-side pad pass).
    xp = jnp.concatenate([top, x_main, bot], axis=0)            # (TH_in+2, W, C_in)
    zcol = jnp.zeros((TH_in + 2, 1, C_in), jnp.float32)
    xp = jnp.concatenate([zcol, xp, zcol], axis=1)              # (TH_in+2, W+2, C_in)

    # ---- depthwise 3x3 conv (pure VPU, f32 accumulation) ----
    wdw = wdw_ref[...].astype(jnp.float32)                      # (3, 3, C_in)
    h_span = (TH - 1) * stride + 1
    w_span = (W_out - 1) * stride + 1
    acc = jnp.zeros((TH, W_out, C_in), jnp.float32)
    for kh in range(3):
        for kw in range(3):
            patch = xp[kh:kh + h_span:stride, kw:kw + w_span:stride, :]
            acc = acc + patch * wdw[kh, kw, :]

    # ---- pointwise 1x1 conv (dw bias / pw bias / BN already folded) ----
    if use_mxu:
        # Large channel counts: feed the MXU bf16, accumulate in f32.
        dw2d = acc.reshape(TH * W_out, C_in).astype(jnp.bfloat16)
        pw = jnp.dot(dw2d, wpw_ref[...], preferred_element_type=jnp.float32)
        pw = pw.reshape(TH, W_out, C_out)
    else:
        # Tiny channel counts: a short VPU FMA loop beats an almost-empty MXU.
        wpw = wpw_ref[...].astype(jnp.float32)                  # (C_in, C_out)
        pw = jnp.zeros((TH, W_out, C_out), jnp.float32)
        for c in range(C_in):
            pw = pw + acc[:, :, c:c + 1] * wpw[c, :]

    y = jnp.maximum(pw + b_ref[0].astype(jnp.float32), 0.0)     # folded bias+BN, ReLU

    if flatten_out:
        out_ref[0] = y.reshape(TH, W_out * C_out).astype(out_ref.dtype)
    else:
        out_ref[0] = y.astype(out_ref.dtype)


# -----------------------------------------------------------------------------
# Wrappers
# -----------------------------------------------------------------------------
def _pick_row_tile(H_out, stride, W, C_in, flatten_out,
                   budget_bytes=4 * 1024 * 1024):
    """Largest row tile (divisor of H_out) whose input block fits a per-buffer
    VMEM budget; prefer >= 2 tiles so the DMA pipeline actually overlaps."""
    valid = [th for th in range(1, H_out + 1)
             if H_out % th == 0 and (not flatten_out or th % 8 == 0 or th == H_out)]

    def in_tile_bytes(th):
        return (th * stride + 2) * (W + 2) * C_in * 4

    fitting = [th for th in valid if in_tile_bytes(th) <= budget_bytes]
    if not fitting:
        return min(valid)
    multi = [th for th in fitting if H_out // th >= 2]
    return max(multi) if multi else max(fitting)


def separable_conv2d_nhwc(x_nhwc, w_dw_33c, wpw_fold, b_fold, *, stride=1,
                          out_dtype=None):
    """Preferred (NHWC) entry point.

    x_nhwc   : (N, H, W, C_in)  unpadded NHWC input
    w_dw_33c : (3, 3, C_in)     depthwise weights
    wpw_fold : (C_in, C_out)    pointwise weight * BN scale
    b_fold   : (C_out,)         (b_dw @ wpw + b_pw) * scale + shift
    returns  : (N, H_out, W_out, C_out)
    """
    N, H, W, C_in = x_nhwc.shape
    C_out = wpw_fold.shape[1]
    H_out = (H + 2 - 3) // stride + 1
    W_out = (W + 2 - 3) // stride + 1

    use_mxu = C_in >= 64         # tiny C_in -> VPU FMA loop, skip the MXU
    flatten_out = C_out < 128    # lane-dense output block when C_out is small
    if out_dtype is None:
        out_dtype = x_nhwc.dtype

    TH = _pick_row_tile(H_out, stride, W, C_in, flatten_out)
    TH_in = TH * stride
    num_tiles = H_out // TH

    w_dw_33c = w_dw_33c.astype(jnp.float32)
    wpw_fold = wpw_fold.astype(jnp.bfloat16 if use_mxu else jnp.float32)
    b_fold = b_fold.reshape(1, C_out).astype(jnp.float32)

    kernel = functools.partial(
        _sepconv_kernel, H=H, W=W, C_in=C_in, C_out=C_out, stride=stride,
        TH=TH, TH_in=TH_in, num_tiles=num_tiles,
        use_mxu=use_mxu, flatten_out=flatten_out)

    if flatten_out:
        out_shape = jax.ShapeDtypeStruct((N, H_out, W_out * C_out), out_dtype)
        out_spec = pl.BlockSpec((1, TH, W_out * C_out), lambda n, t: (n, t, 0))
    else:
        out_shape = jax.ShapeDtypeStruct((N, H_out, W_out, C_out), out_dtype)
        out_spec = pl.BlockSpec((1, TH, W_out, C_out), lambda n, t: (n, t, 0, 0))

    in_specs = [
        # main rows of the tile
        pl.BlockSpec((1, TH_in, W, C_in), lambda n, t: (n, t, 0, 0)),
        # top halo row (clamped into bounds; zeroed in-kernel at the top edge)
        pl.BlockSpec((1, 1, W, C_in),
                     lambda n, t: (n, jnp.maximum(t * TH_in - 1, 0), 0, 0)),
        # bottom halo row (clamped; zeroed in-kernel at the bottom edge)
        pl.BlockSpec((1, 1, W, C_in),
                     lambda n, t: (n, jnp.minimum((t + 1) * TH_in, H - 1), 0, 0)),
        pl.BlockSpec((3, 3, C_in), lambda n, t: (0, 0, 0)),
        pl.BlockSpec((C_in, C_out), lambda n, t: (0, 0)),
        pl.BlockSpec((1, C_out), lambda n, t: (0, 0)),
    ]

    out = pl.pallas_call(
        kernel,
        out_shape=out_shape,
        grid_spec=pltpu.PrefetchScalarGridSpec(
            num_scalar_prefetch=0,
            grid=(N, num_tiles),
            in_specs=in_specs,
            out_specs=out_spec,
        ),
        compiler_params=pltpu.CompilerParams(
            dimension_semantics=("parallel", "parallel"),
            vmem_limit_bytes=48 * 1024 * 1024,
        ),
    )(x_nhwc, x_nhwc, x_nhwc, w_dw_33c, wpw_fold, b_fold)

    if flatten_out:
        out = out.reshape(N, H_out, W_out, C_out)
    return out


def separable_conv2d(x_nchw, w_dw, b_dw, w_pw, b_pw,
                     bn_gamma, bn_beta, bn_mean, bn_var,
                     *, stride=1, eps=1e-5, out_dtype=None):
    """PyTorch-layout (NCHW / OIHW) compatibility wrapper.

    w_dw: (C_in, 1, 3, 3)    depthwise weight (groups=C_in, multiplier 1)
    w_pw: (C_out, C_in, 1, 1) pointwise weight
    Returns NCHW. Prefer `separable_conv2d_nhwc` at the module boundary to avoid
    the NCHW<->NHWC layout transposes.
    """
    # TODO(synk): depthwise channel multiplier > 1 (depthwise out != in) not
    # implemented; fpem_ffm uses in_channels == out_channels.
    N, C_in, H, W = x_nchw.shape
    C_out = w_pw.shape[0]
    f32 = jnp.float32

    # ---- fold depthwise bias + pointwise bias + eval-BN into the pointwise ----
    scale = bn_gamma.astype(f32) / jnp.sqrt(bn_var.astype(f32) + eps)        # (C_out,)
    shift = bn_beta.astype(f32) - bn_mean.astype(f32) * scale                # (C_out,)
    wdw = jnp.transpose(w_dw[:, 0, :, :], (1, 2, 0)).astype(f32)             # (3,3,C_in)
    wpw = jnp.transpose(w_pw[:, :, 0, 0], (1, 0)).astype(f32)                # (C_in,C_out)
    wpw_fold = wpw * scale[None, :]
    b_fold = (b_dw.astype(f32) @ wpw + b_pw.astype(f32)) * scale + shift     # (C_out,)

    # NCHW -> NHWC interface glue only (no HBM-side padding pass).
    x_nhwc = jnp.transpose(x_nchw, (0, 2, 3, 1))
    out_nhwc = separable_conv2d_nhwc(x_nhwc, wdw, wpw_fold, b_fold,
                                     stride=stride, out_dtype=out_dtype)
    return jnp.transpose(out_nhwc, (0, 3, 1, 2))


# -----------------------------------------------------------------------------
# Reference (pure JAX / lax) and test
# -----------------------------------------------------------------------------
def _torch_reference(x, w_dw, b_dw, w_pw, b_pw, gamma, beta, mean, var,
                     stride, eps=1e-5):
    C = x.shape[1]
    dn = jax.lax.conv_dimension_numbers(x.shape, w_dw.shape,
                                        ("NCHW", "OIHW", "NCHW"))
    dw = jax.lax.conv_general_dilated(
        x, w_dw, window_strides=(stride, stride), padding=((1, 1), (1, 1)),
        dimension_numbers=dn, feature_group_count=C) + b_dw[None, :, None, None]
    pw = jax.lax.conv_general_dilated(
        dw, w_pw, window_strides=(1, 1), padding="VALID",
        dimension_numbers=dn) + b_pw[None, :, None, None]
    scale = gamma / jnp.sqrt(var + eps)
    shift = beta - mean * scale
    return jnp.maximum(pw * scale[None, :, None, None]
                       + shift[None, :, None, None], 0.0)


if __name__ == "__main__":
    def run_case(key, N, C, H, W, stride):
        ks = jax.random.split(key, 9)
        x = jax.random.normal(ks[0], (N, C, H, W), dtype=jnp.float32)
        w_dw = 0.2 * jax.random.normal(ks[1], (C, 1, 3, 3), dtype=jnp.float32)
        b_dw = 0.1 * jax.random.normal(ks[2], (C,), dtype=jnp.float32)
        w_pw = 0.2 * jax.random.normal(ks[3], (C, C, 1, 1), dtype=jnp.float32)
        b_pw = 0.1 * jax.random.normal(ks[4], (C,), dtype=jnp.float32)
        gamma = 1.0 + 0.1 * jax.random.normal(ks[5], (C,), dtype=jnp.float32)
        beta = 0.1 * jax.random.normal(ks[6], (C,), dtype=jnp.float32)
        mean = 0.05 * jax.random.normal(ks[7], (C,), dtype=jnp.float32)
        var = 1.0 + 0.1 * jnp.abs(jax.random.normal(ks[8], (C,), dtype=jnp.float32))

        out = separable_conv2d(x, w_dw, b_dw, w_pw, b_pw,
                               gamma, beta, mean, var, stride=stride)
        out = jax.block_until_ready(out)

        ref = _torch_reference(x, w_dw, b_dw, w_pw, b_pw,
                               gamma, beta, mean, var, stride)
        assert out.shape == ref.shape, (out.shape, ref.shape)
        err = float(jnp.max(jnp.abs(out - ref)))
        assert jnp.allclose(out, ref, atol=5e-4, rtol=5e-4), err

    key = jax.random.PRNGKey(0)
    k1, k2 = jax.random.split(key)
    # Canonical small shape (2 row tiles per image -> halo + pipeline path exercised).
    run_case(k1, N=2, C=4, H=16, W=16, stride=1)
    # Different W / C to exercise tile selection with a wider lane-dense output.
    run_case(k2, N=1, C=8, H=16, W=32, stride=1)

    print("KERNEL_OK")
</pallas_src>

<mosaic_0001>
module attributes {stable_mosaic.version = 11 : i64} {
  func.func @_sepconv_kernel(%arg0: i32, %arg1: i32, %arg2: memref<1x8x16x4xf32, #tpu.memory_space<vmem>>, %arg3: memref<1x1x16x4xf32, #tpu.memory_space<vmem>>, %arg4: memref<1x1x16x4xf32, #tpu.memory_space<vmem>>, %arg5: memref<3x3x4xf32, #tpu.memory_space<vmem>>, %arg6: memref<4x4xf32, #tpu.memory_space<vmem>>, %arg7: memref<1x4xf32, #tpu.memory_space<vmem>>, %arg8: memref<1x8x64xf32, #tpu.memory_space<vmem>>) attributes {dimension_semantics = [#tpu.dimension_semantics<parallel>, #tpu.dimension_semantics<parallel>], iteration_bounds = array<i64: 2, 2>, scalar_prefetch = 0 : i64, scratch_operands = 0 : i64, tpu.core_type = #tpu.core_type<tc>, window_params = [{transform_indices = @transform_0, window_bounds = array<i64: 1, 8, 16, 4>}, {transform_indices = @transform_1, window_bounds = array<i64: 1, 1, 16, 4>}, {transform_indices = @transform_2, window_bounds = array<i64: 1, 1, 16, 4>}, {pipeline_mode = #tpu.pipeline_mode<synchronous>, transform_indices = @transform_3, window_bounds = array<i64: 3, 3, 4>}, {pipeline_mode = #tpu.pipeline_mode<synchronous>, transform_indices = @transform_4, window_bounds = array<i64: 4, 4>}, {pipeline_mode = #tpu.pipeline_mode<synchronous>, transform_indices = @transform_5, window_bounds = array<i64: 1, 4>}, {transform_indices = @transform_6, window_bounds = array<i64: 1, 8, 64>}]} {
    %c0 = arith.constant 0 : index
    %c0_0 = arith.constant 0 : index
    %c0_1 = arith.constant 0 : index
    %c0_2 = arith.constant 0 : index
    %0 = vector.load %arg2[%c0, %c0_0, %c0_1, %c0_2] : memref<1x8x16x4xf32, #tpu.memory_space<vmem>>, vector<1x8x16x4xf32>
    %1 = vector.shape_cast %0 : vector<1x8x16x4xf32> to vector<8x16x4xf32>
    %c0_3 = arith.constant 0 : index
    %c0_4 = arith.constant 0 : index
    %c0_5 = arith.constant 0 : index
    %c0_6 = arith.constant 0 : index
    %2 = vector.load %arg3[%c0_3, %c0_4, %c0_5, %c0_6] : memref<1x1x16x4xf32, #tpu.memory_space<vmem>>, vector<1x1x16x4xf32>
    %3 = vector.shape_cast %2 : vector<1x1x16x4xf32> to vector<1x16x4xf32>
    %c0_7 = arith.constant 0 : index
    %c0_8 = arith.constant 0 : index
    %c0_9 = arith.constant 0 : index
    %c0_10 = arith.constant 0 : index
    %4 = vector.load %arg4[%c0_7, %c0_8, %c0_9, %c0_10] : memref<1x1x16x4xf32, #tpu.memory_space<vmem>>, vector<1x1x16x4xf32>
    %5 = vector.shape_cast %4 : vector<1x1x16x4xf32> to vector<1x16x4xf32>
    %c0_i32 = arith.constant 0 : i32
    %6 = arith.cmpi eq, %arg1, %c0_i32 : i32
    %cst = arith.constant 0.000000e+00 : f32
    %7 = vector.broadcast %cst : f32 to vector<1x16x4xf32>
    %8 = arith.select %6, %7, %3 : vector<1x16x4xf32>
    %c1_i32 = arith.constant 1 : i32
    %9 = arith.addi %arg1, %c1_i32 : i32
    %c8_i32 = arith.constant 8 : i32
    %10 = arith.muli %9, %c8_i32 : i32
    %c16_i32 = arith.constant 16 : i32
    %11 = arith.cmpi slt, %10, %c16_i32 : i32
    %cst_11 = arith.constant 0.000000e+00 : f32
    %12 = vector.broadcast %cst_11 : f32 to vector<1x16x4xf32>
    %13 = arith.select %11, %5, %12 : vector<1x16x4xf32>
    %14 = tpu.concatenate %8, %1, %13 in 0 : vector<1x16x4xf32>, vector<8x16x4xf32>, vector<1x16x4xf32> -> vector<10x16x4xf32>
    %cst_12 = arith.constant 0.000000e+00 : f32
    %15 = vector.broadcast %cst_12 : f32 to vector<10x1x4xf32>
    %16 = tpu.concatenate %15, %14, %15 in 1 : vector<10x1x4xf32>, vector<10x16x4xf32>, vector<10x1x4xf32> -> vector<10x18x4xf32>
    %c0_13 = arith.constant 0 : index
    %c0_14 = arith.constant 0 : index
    %c0_15 = arith.constant 0 : index
    %17 = vector.load %arg5[%c0_13, %c0_14, %c0_15] : memref<3x3x4xf32, #tpu.memory_space<vmem>>, vector<3x3x4xf32>
    %cst_16 = arith.constant 0.000000e+00 : f32
    %18 = vector.broadcast %cst_16 : f32 to vector<8x16x4xf32>
    %19 = vector.extract_strided_slice %16 {offsets = [0, 0, 0], sizes = [8, 16, 4], strides = [1, 1, 1]} : vector<10x18x4xf32> to vector<8x16x4xf32>
    %20 = vector.extract_strided_slice %17 {offsets = [0, 0, 0], sizes = [1, 1, 4], strides = [1, 1, 1]} : vector<3x3x4xf32> to vector<1x1x4xf32>
    %21 = vector.shape_cast %20 : vector<1x1x4xf32> to vector<4xf32>
    %22 = vector.shape_cast %21 : vector<4xf32> to vector<1x1x4xf32>
    %23 = vector.broadcast %22 : vector<1x1x4xf32> to vector<8x16x4xf32>
    %24 = arith.mulf %19, %23 : vector<8x16x4xf32>
    %25 = arith.addf %18, %24 : vector<8x16x4xf32>
    %26 = vector.extract_strided_slice %16 {offsets = [0, 1, 0], sizes = [8, 16, 4], strides = [1, 1, 1]} : vector<10x18x4xf32> to vector<8x16x4xf32>
    %27 = vector.extract_strided_slice %17 {offsets = [0, 1, 0], sizes = [1, 1, 4], strides = [1, 1, 1]} : vector<3x3x4xf32> to vector<1x1x4xf32>
    %28 = vector.shape_cast %27 : vector<1x1x4xf32> to vector<4xf32>
    %29 = vector.shape_cast %28 : vector<4xf32> to vector<1x1x4xf32>
    %30 = vector.broadcast %29 : vector<1x1x4xf32> to vector<8x16x4xf32>
    %31 = arith.mulf %26, %30 : vector<8x16x4xf32>
    %32 = arith.addf %25, %31 : vector<8x16x4xf32>
    %33 = vector.extract_strided_slice %16 {offsets = [0, 2, 0], sizes = [8, 16, 4], strides = [1, 1, 1]} : vector<10x18x4xf32> to vector<8x16x4xf32>
    %34 = vector.extract_strided_slice %17 {offsets = [0, 2, 0], sizes = [1, 1, 4], strides = [1, 1, 1]} : vector<3x3x4xf32> to vector<1x1x4xf32>
    %35 = vector.shape_cast %34 : vector<1x1x4xf32> to vector<4xf32>
    %36 = vector.shape_cast %35 : vector<4xf32> to vector<1x1x4xf32>
    %37 = vector.broadcast %36 : vector<1x1x4xf32> to vector<8x16x4xf32>
    %38 = arith.mulf %33, %37 : vector<8x16x4xf32>
    %39 = arith.addf %32, %38 : vector<8x16x4xf32>
    %40 = vector.extract_strided_slice %16 {offsets = [1, 0, 0], sizes = [8, 16, 4], strides = [1, 1, 1]} : vector<10x18x4xf32> to vector<8x16x4xf32>
    %41 = vector.extract_strided_slice %17 {offsets = [1, 0, 0], sizes = [1, 1, 4], strides = [1, 1, 1]} : vector<3x3x4xf32> to vector<1x1x4xf32>
    %42 = vector.shape_cast %41 : vector<1x1x4xf32> to vector<4xf32>
    %43 = vector.shape_cast %42 : vector<4xf32> to vector<1x1x4xf32>
    %44 = vector.broadcast %43 : vector<1x1x4xf32> to vector<8x16x4xf32>
    %45 = arith.mulf %40, %44 : vector<8x16x4xf32>
    %46 = arith.addf %39, %45 : vector<8x16x4xf32>
    %47 = vector.extract_strided_slice %16 {offsets = [1, 1, 0], sizes = [8, 16, 4], strides = [1, 1, 1]} : vector<10x18x4xf32> to vector<8x16x4xf32>
    %48 = vector.extract_strided_slice %17 {offsets = [1, 1, 0], sizes = [1, 1, 4], strides = [1, 1, 1]} : vector<3x3x4xf32> to vector<1x1x4xf32>
    %49 = vector.shape_cast %48 : vector<1x1x4xf32> to vector<4xf32>
    %50 = vector.shape_cast %49 : vector<4xf32> to vector<1x1x4xf32>
    %51 = vector.broadcast %50 : vector<1x1x4xf32> to vector<8x16x4xf32>
    %52 = arith.mulf %47, %51 : vector<8x16x4xf32>
    %53 = arith.addf %46, %52 : vector<8x16x4xf32>
    %54 = vector.extract_strided_slice %16 {offsets = [1, 2, 0], sizes = [8, 16, 4], strides = [1, 1, 1]} : vector<10x18x4xf32> to vector<8x16x4xf32>
    %55 = vector.extract_strided_slice %17 {offsets = [1, 2, 0], sizes = [1, 1, 4], strides = [1, 1, 1]} : vector<3x3x4xf32> to vector<1x1x4xf32>
    %56 = vector.shape_cast %55 : vector<1x1x4xf32> to vector<4xf32>
    %57 = vector.shape_cast %56 : vector<4xf32> to vector<1x1x4xf32>
    %58 = vector.broadcast %57 : vector<1x1x4xf32> to vector<8x16x4xf32>
    %59 = arith.mulf %54, %58 : vector<8x16x4xf32>
    %60 = arith.addf %53, %59 : vector<8x16x4xf32>
    %61 = vector.extract_strided_slice %16 {offsets = [2, 0, 0], sizes = [8, 16, 4], strides = [1, 1, 1]} : vector<10x18x4xf32> to vector<8x16x4xf32>
    %62 = vector.extract_strided_slice %17 {offsets = [2, 0, 0], sizes = [1, 1, 4], strides = [1, 1, 1]} : vector<3x3x4xf32> to vector<1x1x4xf32>
    %63 = vector.shape_cast %62 : vector<1x1x4xf32> to vector<4xf32>
    %64 = vector.shape_cast %63 : vector<4xf32> to vector<1x1x4xf32>
    %65 = vector.broadcast %64 : vector<1x1x4xf32> to vector<8x16x4xf32>
    %66 = arith.mulf %61, %65 : vector<8x16x4xf32>
    %67 = arith.addf %60, %66 : vector<8x16x4xf32>
    %68 = vector.extract_strided_slice %16 {offsets = [2, 1, 0], sizes = [8, 16, 4], strides = [1, 1, 1]} : vector<10x18x4xf32> to vector<8x16x4xf32>
    %69 = vector.extract_strided_slice %17 {offsets = [2, 1, 0], sizes = [1, 1, 4], strides = [1, 1, 1]} : vector<3x3x4xf32> to vector<1x1x4xf32>
    %70 = vector.shape_cast %69 : vector<1x1x4xf32> to vector<4xf32>
    %71 = vector.shape_cast %70 : vector<4xf32> to vector<1x1x4xf32>
    %72 = vector.broadcast %71 : vector<1x1x4xf32> to vector<8x16x4xf32>
    %73 = arith.mulf %68, %72 : vector<8x16x4xf32>
    %74 = arith.addf %67, %73 : vector<8x16x4xf32>
    %75 = vector.extract_strided_slice %16 {offsets = [2, 2, 0], sizes = [8, 16, 4], strides = [1, 1, 1]} : vector<10x18x4xf32> to vector<8x16x4xf32>
    %76 = vector.extract_strided_slice %17 {offsets = [2, 2, 0], sizes = [1, 1, 4], strides = [1, 1, 1]} : vector<3x3x4xf32> to vector<1x1x4xf32>
    %77 = vector.shape_cast %76 : vector<1x1x4xf32> to vector<4xf32>
    %78 = vector.shape_cast %77 : vector<4xf32> to vector<1x1x4xf32>
    %79 = vector.broadcast %78 : vector<1x1x4xf32> to vector<8x16x4xf32>
    %80 = arith.mulf %75, %79 : vector<8x16x4xf32>
    %81 = arith.addf %74, %80 : vector<8x16x4xf32>
    %c0_17 = arith.constant 0 : index
    %c0_18 = arith.constant 0 : index
    %82 = vector.load %arg6[%c0_17, %c0_18] : memref<4x4xf32, #tpu.memory_space<vmem>>, vector<4x4xf32>
    %cst_19 = arith.constant 0.000000e+00 : f32
    %83 = vector.broadcast %cst_19 : f32 to vector<8x16x4xf32>
    %84 = vector.extract_strided_slice %81 {offsets = [0, 0, 0], sizes = [8, 16, 1], strides = [1, 1, 1]} : vector<8x16x4xf32> to vector<8x16x1xf32>
    %85 = vector.extract_strided_slice %82 {offsets = [0, 0], sizes = [1, 4], strides = [1, 1]} : vector<4x4xf32> to vector<1x4xf32>
    %86 = vector.shape_cast %85 : vector<1x4xf32> to vector<4xf32>
    %87 = vector.shape_cast %86 : vector<4xf32> to vector<1x1x4xf32>
    %88 = vector.broadcast %84 : vector<8x16x1xf32> to vector<8x16x4xf32>
    %89 = vector.broadcast %87 : vector<1x1x4xf32> to vector<8x16x4xf32>
    %90 = arith.mulf %88, %89 : vector<8x16x4xf32>
    %91 = arith.addf %83, %90 : vector<8x16x4xf32>
    %92 = vector.extract_strided_slice %81 {offsets = [0, 0, 1], sizes = [8, 16, 1], strides = [1, 1, 1]} : vector<8x16x4xf32> to vector<8x16x1xf32>
    %93 = vector.extract_strided_slice %82 {offsets = [1, 0], sizes = [1, 4], strides = [1, 1]} : vector<4x4xf32> to vector<1x4xf32>
    %94 = vector.shape_cast %93 : vector<1x4xf32> to vector<4xf32>
    %95 = vector.shape_cast %94 : vector<4xf32> to vector<1x1x4xf32>
    %96 = vector.broadcast %92 : vector<8x16x1xf32> to vector<8x16x4xf32>
    %97 = vector.broadcast %95 : vector<1x1x4xf32> to vector<8x16x4xf32>
    %98 = arith.mulf %96, %97 : vector<8x16x4xf32>
    %99 = arith.addf %91, %98 : vector<8x16x4xf32>
    %100 = vector.extract_strided_slice %81 {offsets = [0, 0, 2], sizes = [8, 16, 1], strides = [1, 1, 1]} : vector<8x16x4xf32> to vector<8x16x1xf32>
    %101 = vector.extract_strided_slice %82 {offsets = [2, 0], sizes = [1, 4], strides = [1, 1]} : vector<4x4xf32> to vector<1x4xf32>
    %102 = vector.shape_cast %101 : vector<1x4xf32> to vector<4xf32>
    %103 = vector.shape_cast %102 : vector<4xf32> to vector<1x1x4xf32>
    %104 = vector.broadcast %100 : vector<8x16x1xf32> to vector<8x16x4xf32>
    %105 = vector.broadcast %103 : vector<1x1x4xf32> to vector<8x16x4xf32>
    %106 = arith.mulf %104, %105 : vector<8x16x4xf32>
    %107 = arith.addf %99, %106 : vector<8x16x4xf32>
    %108 = vector.extract_strided_slice %81 {offsets = [0, 0, 3], sizes = [8, 16, 1], strides = [1, 1, 1]} : vector<8x16x4xf32> to vector<8x16x1xf32>
    %109 = vector.extract_strided_slice %82 {offsets = [3, 0], sizes = [1, 4], strides = [1, 1]} : vector<4x4xf32> to vector<1x4xf32>
    %110 = vector.shape_cast %109 : vector<1x4xf32> to vector<4xf32>
    %111 = vector.shape_cast %110 : vector<4xf32> to vector<1x1x4xf32>
    %112 = vector.broadcast %108 : vector<8x16x1xf32> to vector<8x16x4xf32>
    %113 = vector.broadcast %111 : vector<1x1x4xf32> to vector<8x16x4xf32>
    %114 = arith.mulf %112, %113 : vector<8x16x4xf32>
    %115 = arith.addf %107, %114 : vector<8x16x4xf32>
    %c0_20 = arith.constant 0 : index
    %c0_21 = arith.constant 0 : index
    %116 = vector.load %arg7[%c0_20, %c0_21] : memref<1x4xf32, #tpu.memory_space<vmem>>, vector<1x4xf32>
    %117 = vector.shape_cast %116 : vector<1x4xf32> to vector<4xf32>
    %118 = vector.shape_cast %117 : vector<4xf32> to vector<1x1x4xf32>
    %119 = vector.broadcast %118 : vector<1x1x4xf32> to vector<8x16x4xf32>
    %120 = arith.addf %115, %119 : vector<8x16x4xf32>
    %cst_22 = arith.constant 0.000000e+00 : f32
    %121 = vector.broadcast %cst_22 : f32 to vector<8x16x4xf32>
    %122 = arith.maximumf %120, %121 : vector<8x16x4xf32>
    %123 = vector.shape_cast %122 : vector<8x16x4xf32> to vector<8x64xf32>
    %c0_23 = arith.constant 0 : index
    %c0_24 = arith.constant 0 : index
    %c0_25 = arith.constant 0 : index
    %124 = vector.load %arg8[%c0_23, %c0_24, %c0_25] : memref<1x8x64xf32, #tpu.memory_space<vmem>>, vector<1x8x64xf32>
    %125 = vector.shape_cast %124 : vector<1x8x64xf32> to vector<8x64xf32>
    %126 = vector.shape_cast %123 : vector<8x64xf32> to vector<1x8x64xf32>
    tpu.vector_store %arg8[%c0_23, %c0_24, %c0_25], %126 {strides = array<i32>} : memref<1x8x64xf32, #tpu.memory_space<vmem>>, vector<1x8x64xf32>,
    return
  }
  func.func @transform_0(%arg0: i32, %arg1: i32) -> (i32, i32, i32, i32) {
    %c0_i32 = arith.constant 0 : i32
    %c0_i32_0 = arith.constant 0 : i32
    %c0_i32_1 = arith.constant 0 : i32
    return %arg0, %arg1, %c0_i32, %c0_i32_0 : i32, i32, i32, i32
  }
  func.func @transform_1(%arg0: i32, %arg1: i32) -> (i32, i32, i32, i32) {
    %c8_i32 = arith.constant 8 : i32
    %0 = arith.muli %arg1, %c8_i32 : i32
    %c1_i32 = arith.constant 1 : i32
    %1 = arith.subi %0, %c1_i32 : i32
    %c0_i32 = arith.constant 0 : i32
    %2 = arith.maxsi %1, %c0_i32 : i32
    %c0_i32_0 = arith.constant 0 : i32
    %c0_i32_1 = arith.constant 0 : i32
    %c0_i32_2 = arith.constant 0 : i32
    return %arg0, %2, %c0_i32_0, %c0_i32_1 : i32, i32, i32, i32
  }
  func.func @transform_2(%arg0: i32, %arg1: i32) -> (i32, i32, i32, i32) {
    %c1_i32 = arith.constant 1 : i32
    %0 = arith.addi %arg1, %c1_i32 : i32
    %c8_i32 = arith.constant 8 : i32
    %1 = arith.muli %0, %c8_i32 : i32
    %c15_i32 = arith.constant 15 : i32
    %2 = arith.minsi %1, %c15_i32 : i32
    %c0_i32 = arith.constant 0 : i32
    %c0_i32_0 = arith.constant 0 : i32
    %c0_i32_1 = arith.constant 0 : i32
    return %arg0, %2, %c0_i32, %c0_i32_0 : i32, i32, i32, i32
  }
  func.func @transform_3(%arg0: i32, %arg1: i32) -> (i32, i32, i32) {
    %c0_i32 = arith.constant 0 : i32
    %c0_i32_0 = arith.constant 0 : i32
    %c0_i32_1 = arith.constant 0 : i32
    %c0_i32_2 = arith.constant 0 : i32
    return %c0_i32, %c0_i32_0, %c0_i32_1 : i32, i32, i32
  }
  func.func @transform_4(%arg0: i32, %arg1: i32) -> (i32, i32) {
    %c0_i32 = arith.constant 0 : i32
    %c0_i32_0 = arith.constant 0 : i32
    %c0_i32_1 = arith.constant 0 : i32
    return %c0_i32, %c0_i32_0 : i32, i32
  }
  func.func @transform_5(%arg0: i32, %arg1: i32) -> (i32, i32) {
    %c0_i32 = arith.constant 0 : i32
    %c0_i32_0 = arith.constant 0 : i32
    %c0_i32_1 = arith.constant 0 : i32
    return %c0_i32, %c0_i32_0 : i32, i32
  }
  func.func @transform_6(%arg0: i32, %arg1: i32) -> (i32, i32, i32) {
    %c0_i32 = arith.constant 0 : i32
    %c0_i32_0 = arith.constant 0 : i32
    return %arg0, %arg1, %c0_i32 : i32, i32, i32
  }
}

</mosaic_0001>

<bundles_post_ra>
// kernel: tpu_custom_call.1
= control target key start
LH: loop header
LB: loop body
LE: loop exit
PB: predicated region body
PF: predicated region fallthrough
CT: control target
= control target key end

     0   :  { %11 = vsyncpa [#allocation3], 0  ;;  %s4152_s0 = inlined_call_operand.vmem [shape: f32[2,16,16,4], index: 0, kind: input, shape index: {}]   ;;  %s4153_s1 = inlined_call_operand.vmem [shape: f32[2,16,16,4], index: 1, kind: input, shape index: {}]   ;;  %s4154_s2 = inlined_call_operand.vmem [shape: f32[2,16,16,4], index: 2, kind: input, shape index: {}]   ;;  %s4155_s3 = inlined_call_operand.vmem [shape: f32[3,3,4], index: 3, kind: input, shape index: {}]   ;;  %s4156_s4 = inlined_call_operand.vmem [shape: f32[4,4], index: 4, kind: input, shape index: {}]   ;;  %s4157_s5 = inlined_call_operand.vmem [shape: f32[1,4], index: 5, kind: input, shape index: {}]   ;;  %s4158_s6 = inlined_call_operand.hbm [shape: f32[2,16,64], index: 6, kind: output, shape index: {}]  }
   0x1   :  { %13 = vsyncpa [#allocation3 + $0x1], 0  ;;  %s2589_s21 = smov 0   ;;  %s2591_s22 = smov 0  }
   0x2   :  { %s2593_s23 = smov 0   ;;  %s2595_s24 = smov 0  }
   0x3   :  { %s2597_s25 = smov 0   ;;  %s2599_s26 = smov 0  }
   0x4   :  { %s2601_s27 = smov 0   ;;  %s2603_s28 = smov 0  }
   0x5 LB: > { %s2271_s29 = sadd.s32 4294967295, %s2531_s28   ;;  %s2272_s30 = sadd.s32 4294967294, %s2531_s28   ;;  %s2531_s28 = sphi %s2603_s28, %s19_s28   ;;  %s2527_s27 = sphi %s2601_s27, %s4361_s27   ;;  %s2523_s26 = sphi %s2599_s26, %s4360_s26   ;;  %s2519_s25 = sphi %s2597_s25, %s4359_s25   ;;  %s2515_s24 = sphi %s2595_s24, %s4358_s24   ;;  %s2511_s23 = sphi %s2593_s23, %s4357_s23   ;;  %s2507_s22 = sphi %s2591_s22, %s4356_s22   ;;  %s2503_s21 = sphi %s2589_s21, %s4355_s21  }
   0x6   : > { %s28_s7 = sadd.s32 1, %s2523_s26  ;;  %s31_s8 = sadd.s32 1, %s2527_s27 }
   0x7   : > { %p29_p0 = scmp.ge.s32.totalorder %s28_s7, 2  ;;  %p213_p1 = scmp.ne.s32.totalorder %s2511_s23, %s2507_s22 }
   0x8   : > { %p214_p2 = scmp.eq.s32.totalorder %s2271_s29, 3  ;;  %p219_p5 = scmp.ne.s32.totalorder %s2507_s22, %s2503_s21 }
   0x9   : > { %s4363_s7 = smov (%p29_p0, %s28_s7), 0  ;;  %s4365_s8 = smov (!%p29_p0, %s31_s8), %s2527_s27 }
   0xa   : > { %4250 = sst [smem:[#allocation5_spill]] %s4363_s7  ;;  %s199_s9 = ssub.s32 %s2523_s26, %s4363_s7 }
   0xb   : > { %p2640_p3 = por %p214_p2, %p213_p1  ;;  %p33_p4 = scmp.ge.s32.totalorder %s4365_s8, 2 }
   0xc   : > { %p220_p6 = scmp.eq.s32.totalorder %s2272_s30, 3  ;;  %p2281_p7 = scmp.ge.s32.totalorder %s2531_s28, 1 }
   0xd   : > { %s4367_s8 = smov (%p33_p4, %s4365_s8), 0  ;;  %p301_p9 = scmp.lt.s32.totalorder %s2531_s28, 5 }
   0xe   : > { %4252 = sst [smem:[#allocation6_spill]] %s4367_s8  ;;  %p2649_p8 = por %p220_p6, %p219_p5 }
   0xf   : > { %s198_s12 = ssub.s32 %s2527_s27, %s4367_s8  ;;  %s203_s13 = sadd.s32 1, %s2511_s23 }
  0x10   : > { %s200_s14 = sor.u32 %s199_s9, %s198_s12  ;;  %p302_p10 = pnand %p2281_p7, %p301_p9 }
  0x11   : > { %p201_p11 = scmp.eq.s32.totalorder %s200_s14, 0 }
  0x12   : > { %305 = sbr.rel (%p302_p10) target bundleno = 611 (0x263), region = 44 }
  0x13   : > { %s2658_s15 = scalar_select %p201_p11, %s2511_s23, %s203_s13  }
  0x17   : > { %s2661_s16 = sshll.u32 %s2515_s24, 3  ;;  %p363_p12 = scmp.lt.s32.totalorder %s2519_s25, 1  ;;  %v2533_v0 = vmov 0   ;;  %v542_v1 = vld [vmem:[%s4155_s3] sm:$0x7]  ;;  %vm461_vm0 = vcmask 1040384  }
  0x18   : > { %2414 = vset.pattern.permute.xlu0 %v2533_v0  ;;  %2413 = vset.pattern.permute.xlu2 %v2533_v0  ;;  %p365_p13 = scmp.lt.s32.totalorder %s2661_s16, 15  ;;  %s2673_s30 = sadd.s32 4294967295, %s2661_s16  ;;  %v543_v2 = vld [vmem:[%s4155_s3 + $0x4] sm:$0x7]  ;;  %v544_v3 = vld [vmem:[%s4155_s3 + $0x8] sm:$0x7] }
  0x19   : > { %2412 = vset.pattern.permute.xlu1 %v2533_v0  ;;  %s364_s17 = scalar_select %p363_p12, %s2519_s25, 1  ;;  %v2683_v4 = vperm.slane %v542_v1, 0  ;;  %v2685_v5 = vperm.slane %v542_v1, 1  ;;  %vm627_vm1 = vcmask 1046528   ;;  %v2687_v6 = vperm.slane %v542_v1, 2 }
  0x1a   : > { %s366_s18 = scalar_select %p365_p13, %s2661_s16, 15  ;;  %vm749_vm2 = vcmask 1045504   ;;  %v2694_v7 = vperm.slane %v543_v2, 0  ;;  %v2696_v8 = vperm.slane %v543_v2, 1  ;;  %v2698_v9 = vperm.slane %v543_v2, 2 }
  0x1b   : > { %s2667_s19 = sshll.u32 %s364_s17, 5  ;;  %p375_p0 = scmp.gt.s32.totalorder %s2673_s30, 0  ;;  %v2706_v13 = vperm.slane %v544_v3, 0  ;;  %v2708_v14 = vperm.slane %v544_v3, 1  ;;  %v2723_v24 = vperm.slane %v544_v3, 2  ;;  %vm1814_vm3 = vcmask 1047556  }
  0x1c   : > { %s2284_s9 = sshll.u32 %s366_s18, 1  ;;  %p2289_p1 = scmp.lt.s32.totalorder %s2673_s30, 15  ;;  %vm2098_vm4 = vcmask 31744   ;;  %vm2100_vm5 = vcmask 64512   ;;  %vm2102_vm6 = vcmask 97280   ;;  %vm2104_vm7 = vcmask 130048  }
  0x1d   : > { %s369_s14 = sadd.s32 %s2667_s19, %s2284_s9  ;;  %p427_p5 = scmp.eq.s32.totalorder %s2515_s24, 0  ;;  %vm2106_vm8 = vcmask 162816   ;;  %vm2108_vm9 = vcmask 195584   ;;  %vm2110_vm10 = vcmask 228352   ;;  %vm2112_vm11 = vcmask 261120  }
  0x1e   : > { %s2286_s7 = sshll.u32 %s369_s14, 3  ;;  %s2541_s18 = smov 4   ;;  %vm2114_vm12 = vcmask 293888   ;;  %vm2116_vm13 = vcmask 326656   ;;  %vm2118_vm14 = vcmask 359424   ;;  %vm2120_vm15 = vcmask 392192  }
  0x1f   : > { %s2692_s29 = scalar_lea.vmem %s4152_s0, %s2286_s7  ;;  %s2542_s20 = smov 24  }
  0x20   : > { %v411_v10 = vld [vmem:[%s2692_s29 + $0x20] sm:$0xff]  ;;  %v2703_v11 = vld [vmem:[%s2692_s29 + $0x28] sm:$0xff]  ;;  %v413_v12 = vld [vmem:[%s2692_s29 + $0x30] sm:$0xff]  ;;  %s376_s7 = scalar_select %p375_p0, %s2673_s30, 0 }
  0x21   : > { %v2714_v15 = vld [vmem:[%s2692_s29 + $0x38] sm:$0xff]  ;;  %v415_v16 = vld [vmem:[%s2692_s29 + $0x40] sm:$0xff]  ;;  %v2718_v17 = vld [vmem:[%s2692_s29 + $0x48] sm:$0xff]  ;;  %v471_v18 = vrot.slane %v411_v10, 7  ;;  %v4174_v19 = vrot.slane %v2703_v11, 7  ;;  %v474_v20 = vrot.slane %v413_v12, 7 }
  0x22   : > { %v475_v21 = vrot.slane %v2714_v15, 7  ;;  %v477_v22 = vrot.slane %v415_v16, 7  ;;  %v4179_v23 = vrot.slane %v2718_v17, 7  ;;  %v409_v25 = vld [vmem:[%s2692_s29 + $0x10] sm:$0xff]  ;;  %s4369_s7 = smov (!%p2289_p1, %s376_s7), 15  ;;  %s2767_s30 = sadd.s32 8, %s2661_s16 }
  0x23   : > { %v2729_v26 = vsel %vm461_vm0, %v471_v18, %v4174_v19  ;;  %v2732_v27 = vsel %vm461_vm0, 0.0, %v471_v18  ;;  %v2735_v28 = vsel %vm461_vm0, 0.0, %v474_v20  ;;  %v468_v29 = vrot.slane %v409_v25, 7  ;;  %s2294_s8 = sshll.u32 %s4369_s7, 1  ;;  %v2790_v50 = vld [vmem:[%s2692_s29 + $0x18] sm:$0xff]  ;;  %p392_p2 = scmp.lt.s32.totalorder %s2767_s30, 15 }
  0x24   : > { %v2742_v30 = vsel %vm461_vm0, %v474_v20, %v475_v21  ;;  %v2747_v31 = vsel %vm461_vm0, %v477_v22, %v4179_v23  ;;  %v2750_v32 = vsel %vm461_vm0, 0.0, %v477_v22  ;;  %v552_v33 = vmul.f32 %v2683_v4, %v2732_v27  ;;  %s2780_s9 = sadd.s32 %s2294_s8, %s2667_s19  ;;  %p435_p4 = scmp.lt.s32.totalorder %s2767_s30, 16 }
  0x25   : > { %4254 = vst [vmem:[#allocation7_spill] sm:$0xff] %v2747_v31  ;;  %v588_v34 = vmul.f32 %v2685_v5, %v2732_v27  ;;  %v2758_v35 = vmul.f32 %v2685_v5, %v2729_v26  ;;  %v710_v36 = vmul.f32 %v2687_v6, %v2732_v27  ;;  %v2764_v37 = vmul.f32 %v2687_v6, %v2729_v26  ;;  %s393_s16 = scalar_select %p392_p2, %s2767_s30, 15 }
  0x26   : > { %v829_v38 = vmul.f32 %v2694_v7, %v2735_v28  ;;  %v865_v39 = vmul.f32 %v2696_v8, %v2735_v28  ;;  %v2775_v40 = vmul.f32 %v2696_v8, %v2742_v30  ;;  %v986_v41 = vmul.f32 %v2698_v9, %v2735_v28  ;;  %s2431_s17 = scalar_select %p435_p4, 255, 0 }
  0x27   : > { %4255 = vst [vmem:[#allocation8_spill] sm:$0xff] %v2758_v35  ;;  %v643_v42 = vrot.slane %v588_v34, 1  ;;  %v4166_v43 = vrot.slane %v2758_v35, 1  ;;  %v765_v44 = vrot.slane %v710_v36, 2  ;;  %v4165_v45 = vrot.slane %v2764_v37, 2  ;;  %s4371_s16 = smov (!%p392_p2, %s393_s16), 15 }
  0x28   : > { %4256 = vst [vmem:[#allocation9_spill] sm:$0xff] %v2764_v37  ;;  %v919_v46 = vrot.slane %v865_v39, 1  ;;  %v4164_v47 = vrot.slane %v2775_v40, 1  ;;  %v2787_v48 = vmul.f32 %v2698_v9, %v2742_v30  ;;  %v1040_v49 = vrot.slane %v986_v41, 2  ;;  %s2301_s12 = sshll.u32 %s4371_s16, 1  ;;  %s2545_s8 = smov 36  }
  0x29   : > { %4257 = vst [vmem:[#allocation10_spill] sm:$0xff] %v2775_v40  ;;  %v645_v51 = vsel %vm627_vm1, %v643_v42, %v4166_v43  ;;  %v767_v52 = vsel %vm749_vm2, %v765_v44, %v4165_v45  ;;  %v1104_v53 = vmul.f32 %v2706_v13, %v2750_v32  ;;  %v1140_v54 = vmul.f32 %v2708_v14, %v2750_v32  ;;  %s2869_s13 = sadd.s32 %s2301_s12, %s2667_s19  ;;  %s2296_s19 = sshll.u32 %s2780_s9, 3 }
  0x2a   : > { %4258 = vst [vmem:[#allocation11_spill] sm:$0xff] %v2787_v48  ;;  %v690_v55 = vadd.f32 %v645_v51, %v552_v33  ;;  %v921_v56 = vsel %vm627_vm1, %v919_v46, %v4164_v47  ;;  %v4163_v57 = vrot.slane %v2787_v48, 2  ;;  %v2809_v58 = vmul.f32 %v2708_v14, %v2747_v31  ;;  %s2303_s14 = sshll.u32 %s2869_s13, 3  ;;  %s385_s16 = scalar_lea.vmem %s4153_s1, %s2296_s19 }
  0x2b   : > { %v1194_v59 = vrot.slane %v1140_v54, 1  ;;  %v1261_v60 = vmul.f32 %v2723_v24, %v2750_v32  ;;  %v2815_v61 = vmul.f32 %v2723_v24, %v2747_v31  ;;  %v4175_v62 = vrot.slane %v2790_v50, 7  ;;  %s3387_s7 = scalar_select %p427_p5, 0, 255 }
  0x2c   : > { %4259 = vst [vmem:[#allocation12_spill] sm:$0xff] %v2809_v58  ;;  %v812_v63 = vadd.f32 %v767_v52, %v690_v55  ;;  %v1042_v0 = vsel %vm749_vm2, %v1040_v49, %v4163_v57  ;;  %v4162_v1 = vrot.slane %v2809_v58, 1  ;;  %v2823_v2 = vsel %vm461_vm0, 0.0, %v468_v29  ;;  %s2546_s30 = smov 28   ;;  %s2548_s9 = smov 48  }
  0x2d   : > { %4260 = vst [vmem:[#allocation13_spill] sm:$0xff] %v2815_v61  ;;  %v1315_v3 = vrot.slane %v1261_v60, 2  ;;  %v4161_v10 = vrot.slane %v2815_v61, 2  ;;  %v2832_v12 = vsel %vm461_vm0, %v468_v29, %v4175_v62  ;;  %v550_v16 = vmul.f32 %v2683_v4, %v2823_v2  ;;  %s2549_s12 = smov 40   ;;  %s2550_s13 = smov 44  }
  0x2e   : > { %4261 = vst [vmem:[#allocation14_spill] sm:$0xff] %v2823_v2  ;;  %v845_v18 = vadd.f32 %v829_v38, %v812_v63  ;;  %v1196_v20 = vsel %vm627_vm1, %v1194_v59, %v4162_v1  ;;  %v585_v22 = vmul.f32 %v2685_v5, %v2823_v2  ;;  %v2843_v25 = vmul.f32 %v2685_v5, %v2832_v12  ;;  %s2551_s19 = smov 60  }
  0x2f   : > { %v1317_v29 = vsel %vm749_vm2, %v1315_v3, %v4161_v10  ;;  %v707_v33 = vmul.f32 %v2687_v6, %v2823_v2  ;;  %v2854_v34 = vmul.f32 %v2687_v6, %v2832_v12  ;;  %v827_v36 = vmul.f32 %v2694_v7, %v2732_v27 }
  0x30   : > { %v966_v38 = vadd.f32 %v921_v56, %v845_v18  ;;  %v638_v39 = vrot.slane %v585_v22, 1  ;;  %v4173_v41 = vrot.slane %v2843_v25, 1  ;;  %v862_v42 = vmul.f32 %v2696_v8, %v2732_v27 }
  0x31   : > { %v760_v44 = vrot.slane %v707_v33, 2  ;;  %v4172_v46 = vrot.slane %v2854_v34, 2  ;;  %v2864_v49 = vmul.f32 %v2696_v8, %v2729_v26  ;;  %v983_v51 = vmul.f32 %v2698_v9, %v2732_v27 }
  0x32   : > { %v1087_v52 = vadd.f32 %v1042_v0, %v966_v38  ;;  %v640_v54 = vsel %vm627_vm1, %v638_v39, %v4173_v41  ;;  %v914_v55 = vrot.slane %v862_v42, 1  ;;  %v2876_v56 = vmul.f32 %v2698_v9, %v2729_v26  ;;  %v407_v38 = vld [vmem:[%s2692_s29] sm:$0xff]  ;;  %v417_v41 = vld [vmem:[%s2692_s29 + $0x50] sm:$0xff] }
  0x33   : > { %v688_v59 = vadd.f32 %v640_v54, %v550_v16  ;;  %v762_v60 = vsel %vm749_vm2, %v760_v44, %v4172_v46  ;;  %v4170_v63 = vrot.slane %v2864_v49, 1  ;;  %v1035_v3 = vrot.slane %v983_v51, 2  ;;  %v2898_v44 = vld [vmem:[%s2692_s29 + $0x8] sm:$0xff] }
  0x34   : > { %v1120_v18 = vadd.f32 %v1104_v53, %v1087_v52  ;;  %v4169_v0 = vrot.slane %v2876_v56, 2  ;;  %v1102_v22 = vmul.f32 %v2706_v13, %v2735_v28  ;;  %v1137_v33 = vmul.f32 %v2708_v14, %v2735_v28 }
  0x35   : > { %v810_v39 = vadd.f32 %v762_v60, %v688_v59  ;;  %v916_v16 = vsel %vm627_vm1, %v914_v55, %v4170_v63  ;;  %v2893_v42 = vmul.f32 %v2708_v14, %v2742_v30  ;;  %v1258_v53 = vmul.f32 %v2723_v24, %v2735_v28 }
  0x36   : > { %v1241_v51 = vadd.f32 %v1196_v20, %v1120_v18  ;;  %v1037_v52 = vsel %vm749_vm2, %v1035_v3, %v4169_v0  ;;  %v1189_v54 = vrot.slane %v1137_v33, 1  ;;  %v2905_v59 = vmul.f32 %v2723_v24, %v2742_v30 }
  0x37   : > { %v843_v55 = vadd.f32 %v827_v36, %v810_v39  ;;  %v4168_v60 = vrot.slane %v2893_v42, 1  ;;  %v1310_v10 = vrot.slane %v1258_v53, 2  ;;  %v465_v1 = vrot.slane %v407_v38, 7 }
  0x38   : > { %v2908_v57 = vadd.f32 %v1317_v29, %v1241_v51  ;;  %v4167_v47 = vrot.slane %v2905_v59, 2  ;;  %v4171_v20 = vrot.slane %v2898_v44, 7  ;;  %v825_v18 = vmul.f32 %v2694_v7, %v2823_v2 }
  0x39   : > { %v964_v3 = vadd.f32 %v916_v16, %v843_v55  ;;  %v1191_v33 = vsel %vm627_vm1, %v1189_v54, %v4168_v60  ;;  %v2918_v36 = vsel %vm461_vm0, 0.0, %v465_v1  ;;  %v859_v38 = vmul.f32 %v2696_v8, %v2823_v2 }
  0x3a   : > { %4262 = vst [vmem:[#allocation15_spill] sm:$0xff] %v2908_v57  ;;  %1405 = vperm.xlu0 %2414, %v2908_v57   ;;  %v1312_v29 = vsel %vm749_vm2, %v1310_v10, %v4167_v47  ;;  %v2929_v39 = vsel %vm461_vm0, %v465_v1, %v4171_v20  ;;  %v548_v16 = vmul.f32 %v2683_v4, %v2918_v36 }
  0x3b   : > { %4263 = vst [vmem:[#allocation16_spill] sm:$0xff] %v2918_v36  ;;  %v582_v53 = vmul.f32 %v2685_v5, %v2918_v36  ;;  %v1085_v51 = vadd.f32 %v1037_v52, %v964_v3  ;;  %v2937_v54 = vmul.f32 %v2685_v5, %v2929_v39  ;;  %v704_v55 = vmul.f32 %v2687_v6, %v2918_v36 }
  0x3c   : > { %v2943_v10 = vmul.f32 %v2687_v6, %v2929_v39  ;;  %v2947_v45 = vmul.f32 %v2696_v8, %v2832_v12  ;;  %v909_v43 = vrot.slane %v859_v38, 1  ;;  %v980_v52 = vmul.f32 %v2698_v9, %v2823_v2 }
  0x3d   : > { %v633_v1 = vrot.slane %v582_v53, 1  ;;  %v1118_v3 = vadd.f32 %v1102_v22, %v1085_v51  ;;  %v4176_v47 = vrot.slane %v2937_v54, 1  ;;  %v755_v60 = vrot.slane %v704_v55, 2 }
  0x3e   : > { %v4178_v0 = vrot.slane %v2943_v10, 2  ;;  %v4177_v63 = vrot.slane %v2947_v45, 1  ;;  %v2956_v53 = vmul.f32 %v2698_v9, %v2832_v12  ;;  %v1030_v20 = vrot.slane %v980_v52, 2 }
  0x3f   : > { %v1100_v38 = vmul.f32 %v2706_v13, %v2732_v27  ;;  %v1239_v46 = vadd.f32 %v1191_v33, %v1118_v3  ;;  %v635_v22 = vsel %vm627_vm1, %v633_v1, %v4176_v47  ;;  %v1134_v55 = vmul.f32 %v2708_v14, %v2732_v27  ;;  %v418_v1 = vld [vmem:[%s2692_s29 + $0x58] sm:$0xff] }
  0x40   : > { %v757_v51 = vsel %vm749_vm2, %v755_v60, %v4178_v0  ;;  %v686_v19 = vadd.f32 %v635_v22, %v548_v16  ;;  %v911_v52 = vsel %vm627_vm1, %v909_v43, %v4177_v63  ;;  %v4182_v62 = vrot.slane %v2956_v53, 2 }
  0x41   : > { %v2975_v33 = vmul.f32 %v2708_v14, %v2729_v26  ;;  %v2978_v3 = vadd.f32 %v1312_v29, %v1239_v46  ;;  %v1184_v47 = vrot.slane %v1134_v55, 1  ;;  %v1255_v60 = vmul.f32 %v2723_v24, %v2732_v27 }
  0x42   : > { %v2984_v16 = vmul.f32 %v2723_v24, %v2729_v26  ;;  %v808_v22 = vadd.f32 %v757_v51, %v686_v19  ;;  %v1032_v43 = vsel %vm749_vm2, %v1030_v20, %v4182_v62  ;;  %v480_v0 = vrot.slane %v417_v41, 7 }
  0x43   : > { %4264 = vst [vmem:[#allocation17_spill] sm:$0xff] %v2978_v3  ;;  %v4181_v63 = vrot.slane %v2975_v33, 1  ;;  %1395 = vperm.xlu2 %2413, %v2978_v3   ;;  %v1305_v46 = vrot.slane %v1255_v60, 2  ;;  %v481_v55 = vrot.slane %v418_v1, 7  ;;  %v2995_v27 = vsel %vm461_vm0, %v475_v21, 0.0 }
  0x44   : > { %v4180_v29 = vrot.slane %v2984_v16, 2  ;;  %v841_v23 = vadd.f32 %v825_v18, %v808_v22  ;;  %v3001_v20 = vsel %vm461_vm0, 0.0, %v480_v0  ;;  %v4265_v41 = vrot.slane %v2718_v17, 7 }
  0x45   : > { %v1186_v19 = vsel %vm627_vm1, %v1184_v47, %v4181_v63  ;;  %v3012_v21 = vsel %vm461_vm0, %v480_v0, %v481_v55  ;;  %v3015_v18 = vsel %vm461_vm0, %v481_v55, 0.0  ;;  %v555_v47 = vmul.f32 %v2683_v4, %v2742_v30 }
  0x46   : > { %v3006_v51 = vsel %vm461_vm0, %v4265_v41, 0.0  ;;  %v1307_v15 = vsel %vm749_vm2, %v1305_v46, %v4180_v29  ;;  %4267 = vst [vmem:[#allocation19_spill] sm:$0xff] %v3015_v18  ;;  %v962_v1 = vadd.f32 %v911_v52, %v841_v23  ;;  %v3021_v17 = vmul.f32 %v2685_v5, %v2742_v30 }
  0x47   : > { %4266 = vst [vmem:[#allocation18_spill] sm:$0xff] %v3006_v51  ;;  %v593_v60 = vmul.f32 %v2685_v5, %v2995_v27  ;;  %v3027_v22 = vmul.f32 %v2687_v6, %v2742_v30  ;;  %v715_v0 = vmul.f32 %v2687_v6, %v2995_v27  ;;  %v832_v46 = vmul.f32 %v2694_v7, %v2747_v31 }
  0x48   : > { %v3035_v23 = vmul.f32 %v2696_v8, %v2747_v31  ;;  %v870_v52 = vmul.f32 %v2696_v8, %v3006_v51  ;;  %v1083_v55 = vadd.f32 %v1032_v43, %v962_v1  ;;  %v4193_v41 = vrot.slane %v3021_v17, 1 }
  0x49   : > { %v651_v29 = vrot.slane %v593_v60, 1  ;;  %v4195_v63 = vrot.slane %v3027_v22, 2  ;;  %v773_v62 = vrot.slane %v715_v0, 2  ;;  %v3044_v2 = vmul.f32 %v2698_v9, %v2747_v31 }
  0x4a   : > { %v4194_v57 = vrot.slane %v3035_v23, 1  ;;  %v927_v3 = vrot.slane %v870_v52, 1  ;;  %v1116_v36 = vadd.f32 %v1100_v38, %v1083_v55  ;;  %v991_v43 = vmul.f32 %v2698_v9, %v3006_v51 }
  0x4b   : > { %v652_v61 = vsel %vm627_vm1, %v4193_v41, %v651_v29  ;;  %v1107_v1 = vmul.f32 %v2706_v13, %v3012_v21  ;;  %v774_v0 = vsel %vm749_vm2, %v4195_v63, %v773_v62  ;;  %v4200_v38 = vrot.slane %v3044_v2, 2 }
  0x4c   : > { %v693_v60 = vadd.f32 %v652_v61, %v555_v47  ;;  %v928_v52 = vsel %vm627_vm1, %v4194_v57, %v927_v3  ;;  %v1237_v55 = vadd.f32 %v1186_v19, %v1116_v36  ;;  %v1048_v58 = vrot.slane %v991_v43, 2 }
  0x4d   : > { %v3062_v29 = vmul.f32 %v2708_v14, %v3012_v21  ;;  %v1145_v41 = vmul.f32 %v2708_v14, %v3015_v18  ;;  %v3068_v47 = vmul.f32 %v2723_v24, %v3012_v21  ;;  %v1266_v62 = vmul.f32 %v2723_v24, %v3015_v18 }
  0x4e   : > { %v815_v61 = vadd.f32 %v774_v0, %v693_v60  ;;  %v4268_v3 = vrot.slane %v2790_v50, 7  ;;  %v3077_v19 = vadd.f32 %v1307_v15, %v1237_v55  ;;  %v1049_v43 = vsel %vm749_vm2, %v4200_v38, %v1048_v58 }
  0x4f   : > { %v4199_v60 = vrot.slane %v3062_v29, 1  ;;  %v1202_v0 = vrot.slane %v1145_v41, 1  ;;  %v4201_v63 = vrot.slane %v3068_v47, 2  ;;  %v1323_v48 = vrot.slane %v1266_v62, 2 }
  0x50   : > { %v3075_v36 = vsel %vm461_vm0, %v4268_v3, 0.0  ;;  %4269 = vst [vmem:[#allocation20_spill] sm:$0xff] %v3077_v19  ;;  %v848_v57 = vadd.f32 %v832_v46, %v815_v61  ;;  %v4270_v18 = vrot.slane %v2703_v11, 7  ;;  %1385 = vperm.xlu1 %2412, %v3077_v19   ;;  %v551_v58 = vmul.f32 %v2683_v4, %v2832_v12 }
  0x51   : > { %v1203_v15 = vsel %vm627_vm1, %v4199_v60, %v1202_v0  ;;  %v587_v46 = vmul.f32 %v2685_v5, %v3075_v36  ;;  %v709_v41 = vmul.f32 %v2687_v6, %v3075_v36  ;;  %v1324_v11 = vsel %vm749_vm2, %v4201_v63, %v1323_v48 }
  0x52   : > { %v3087_v50 = vsel %vm461_vm0, %v4270_v18, 0.0  ;;  %v969_v55 = vadd.f32 %v928_v52, %v848_v57  ;;  %v828_v18 = vmul.f32 %v2694_v7, %v2729_v26  ;;  %v1103_v60 = vmul.f32 %v2706_v13, %v2742_v30 }
  0x53   : > { %v864_v61 = vmul.f32 %v2696_v8, %v3087_v50  ;;  %v641_v62 = vrot.slane %v587_v46, 1  ;;  %v763_v3 = vrot.slane %v709_v41, 2  ;;  %v985_v0 = vmul.f32 %v2698_v9, %v3087_v50 }
  0x54   : > { %v1090_v38 = vadd.f32 %v1049_v43, %v969_v55  ;;  %v1139_v52 = vmul.f32 %v2708_v14, %v2995_v27  ;;  %v1260_v48 = vmul.f32 %v2723_v24, %v2995_v27  ;;  %v4271_v63 = vrot.slane %v2843_v25, 1 }
  0x55   : > { %v917_v57 = vrot.slane %v864_v61, 1  ;;  %v4272_v46 = vrot.slane %v2854_v34, 2  ;;  %v1038_v40 = vrot.slane %v985_v0, 2  ;;  %v4273_v51 = vrot.slane %v2898_v44, 7 }
  0x56   : > { %v642_v19 = vsel %vm627_vm1, %v4271_v63, %v641_v62  ;;  %v1123_v55 = vadd.f32 %v1107_v1, %v1090_v38  ;;  %v4274_v31 = vrot.slane %v2864_v49, 1  ;;  %v1192_v35 = vrot.slane %v1139_v52, 1 }
  0x57   : > { %v764_v41 = vsel %vm749_vm2, %v4272_v46, %v763_v3  ;;  %v3123_v43 = vsel %vm461_vm0, %v4273_v51, 0.0  ;;  %v689_v61 = vadd.f32 %v642_v19, %v551_v58  ;;  %v4275_v25 = vrot.slane %v2876_v56, 2 }
  0x58   : > { %v918_v37 = vsel %vm627_vm1, %v4274_v31, %v917_v57  ;;  %v1313_v34 = vrot.slane %v1260_v48, 2  ;;  %v549_v62 = vmul.f32 %v2683_v4, %v2929_v39  ;;  %v584_v44 = vmul.f32 %v2685_v5, %v3123_v43  ;;  %v419_v57 = vld [vmem:[%s2692_s29 + $0x60] sm:$0xff] }
  0x59   : > { %v1039_v63 = vsel %vm749_vm2, %v4275_v25, %v1038_v40  ;;  %v1244_v51 = vadd.f32 %v1203_v15, %v1123_v55  ;;  %v811_v1 = vadd.f32 %v764_v41, %v689_v61  ;;  %v4276_v38 = vrot.slane %v2893_v42, 1 }
  0x5a   : > { %v706_v49 = vmul.f32 %v2687_v6, %v3123_v43  ;;  %v4277_v40 = vrot.slane %v2905_v59, 2  ;;  %v636_v19 = vrot.slane %v584_v44, 1  ;;  %v826_v58 = vmul.f32 %v2694_v7, %v2832_v12  ;;  %v3168_v44 = vld [vmem:[%s2692_s29 + $0x78] sm:$0xff] }
  0x5b   : > { %v1193_v31 = vsel %vm627_vm1, %v4276_v38, %v1192_v35  ;;  %v861_v15 = vmul.f32 %v2696_v8, %v3075_v36  ;;  %v3147_v3 = vadd.f32 %v1324_v11, %v1244_v51  ;;  %v844_v42 = vadd.f32 %v828_v18, %v811_v1  ;;  %v3160_v11 = vld [vmem:[%s2692_s29 + $0x68] sm:$0xff] }
  0x5c   : > { %v1314_v56 = vsel %vm749_vm2, %v4277_v40, %v1313_v34  ;;  %v758_v35 = vrot.slane %v706_v49, 2  ;;  %v982_v0 = vmul.f32 %v2698_v9, %v3075_v36  ;;  %v4279_v59 = vrot.slane %v2937_v54, 1  ;;  %v421_v34 = vld [vmem:[%s2692_s29 + $0x70] sm:$0xff]  ;;  %s402_s29 = scalar_lea.vmem %s4154_s2, %s2303_s14  ;;  %s2539_s14 = smov 12  }
  0x5d   : > { %4278 = vst [vmem:[#allocation21_spill] sm:$0xff] %v3147_v3  ;;  %v912_v48 = vrot.slane %v861_v15, 1  ;;  %v1101_v46 = vmul.f32 %v2706_v13, %v2729_v26  ;;  %v1136_v41 = vmul.f32 %v2708_v14, %v3087_v50  ;;  %1420 = vperm.xlu0 %2414, %v3147_v3   ;;  %v965_v18 = vadd.f32 %v918_v37, %v844_v42 }
  0x5e   : > { %v637_v52 = vsel %vm627_vm1, %v4279_v59, %v636_v19  ;;  %v4280_v61 = vrot.slane %v2943_v10, 2  ;;  %v1033_v54 = vrot.slane %v982_v0, 2  ;;  %v4281_v51 = vrot.slane %v2947_v45, 1 }
  0x5f   : > { %v687_v55 = vadd.f32 %v637_v52, %v549_v62  ;;  %v1187_v38 = vrot.slane %v1136_v41, 1  ;;  %v1257_v49 = vmul.f32 %v2723_v24, %v3087_v50  ;;  %v483_v40 = vrot.slane %v419_v57, 7 }
  0x60   : > { %v759_v25 = vsel %vm749_vm2, %v4280_v61, %v758_v35  ;;  %v913_v1 = vsel %vm627_vm1, %v4281_v51, %v912_v48  ;;  %v1086_v19 = vadd.f32 %v1039_v63, %v965_v18  ;;  %v4282_v62 = vrot.slane %v2956_v53, 2 }
  0x61   : > { %v809_v37 = vadd.f32 %v759_v25, %v687_v55  ;;  %v4217_v15 = vrot.slane %v3160_v11, 7  ;;  %v4283_v42 = vrot.slane %v2975_v33, 1  ;;  %v1308_v45 = vrot.slane %v1257_v49, 2 }
  0x62   : > { %v1034_v10 = vsel %vm749_vm2, %v4282_v62, %v1033_v54  ;;  %v486_v0 = vrot.slane %v421_v34, 7  ;;  %v4216_v59 = vrot.slane %v3168_v44, 7  ;;  %v1119_v52 = vadd.f32 %v1103_v60, %v1086_v19 }
  0x63   : > { %v1188_v35 = vsel %vm627_vm1, %v4283_v42, %v1187_v38  ;;  %v842_v48 = vadd.f32 %v826_v58, %v809_v37  ;;  %v3186_v63 = vsel %vm461_vm0, %v483_v40, %v4217_v15  ;;  %v3189_v53 = vsel %vm461_vm0, 0.0, %v483_v40 }
  0x64   : > { %v4284_v57 = vrot.slane %v2984_v16, 2  ;;  %v3197_v41 = vsel %vm461_vm0, %v486_v0, %v4216_v59  ;;  %v3200_v60 = vsel %vm461_vm0, 0.0, %v486_v0  ;;  %v558_v58 = vmul.f32 %v2683_v4, %v3001_v20 }
  0x65   : > { %v1240_v18 = vadd.f32 %v1193_v31, %v1119_v52  ;;  %v963_v55 = vadd.f32 %v913_v1, %v842_v48  ;;  %v597_v61 = vmul.f32 %v2685_v5, %v3001_v20  ;;  %v3208_v16 = vmul.f32 %v2685_v5, %v3012_v21 }
  0x66   : > { %v1309_v33 = vsel %vm749_vm2, %v4284_v57, %v1308_v45  ;;  %v719_v25 = vmul.f32 %v2687_v6, %v3001_v20  ;;  %v3214_v54 = vmul.f32 %v2687_v6, %v3012_v21  ;;  %v835_v34 = vmul.f32 %v2694_v7, %v3189_v53 }
  0x67   : > { %v874_v31 = vmul.f32 %v2696_v8, %v3189_v53  ;;  %v3220_v51 = vadd.f32 %v1314_v56, %v1240_v18  ;;  %v1084_v1 = vadd.f32 %v1034_v10, %v963_v55  ;;  %v658_v38 = vrot.slane %v597_v61, 1 }
  0x68   : > { %v4215_v49 = vrot.slane %v3208_v16, 1  ;;  %v780_v40 = vrot.slane %v719_v25, 2  ;;  %v4213_v19 = vrot.slane %v3214_v54, 2  ;;  %v3226_v37 = vmul.f32 %v2696_v8, %v3186_v63 }
  0x69   : > { %4285 = vst [vmem:[#allocation22_spill] sm:$0xff] %v3220_v51  ;;  %v934_v62 = vrot.slane %v874_v31, 1  ;;  %1400 = vperm.xlu2 %2413, %v3220_v51   ;;  %v1117_v42 = vadd.f32 %v1101_v46, %v1084_v1  ;;  %v995_v10 = vmul.f32 %v2698_v9, %v3189_v53  ;;  %v3236_v45 = vmul.f32 %v2698_v9, %v3186_v63 }
  0x6a   : > { %4286 = vst [vmem:[#allocation23_spill] sm:$0xff] %v3226_v37  ;;  %v660_v56 = vsel %vm627_vm1, %v658_v38, %v4215_v49  ;;  %v782_v52 = vsel %vm749_vm2, %v780_v40, %v4213_v19  ;;  %v4212_v48 = vrot.slane %v3226_v37, 1  ;;  %v1110_v46 = vmul.f32 %v2706_v13, %v3200_v60 }
  0x6b   : > { %4287 = vst [vmem:[#allocation24_spill] sm:$0xff] %v3236_v45  ;;  %v696_v0 = vadd.f32 %v660_v56, %v558_v58  ;;  %v1238_v57 = vadd.f32 %v1188_v35, %v1117_v42  ;;  %v1055_v18 = vrot.slane %v995_v10, 2  ;;  %v4211_v55 = vrot.slane %v3236_v45, 2 }
  0x6c   : > { %v1149_v61 = vmul.f32 %v2708_v14, %v3200_v60  ;;  %v936_v58 = vsel %vm627_vm1, %v934_v62, %v4212_v48  ;;  %v3252_v31 = vmul.f32 %v2708_v14, %v3197_v41  ;;  %v1270_v1 = vmul.f32 %v2723_v24, %v3200_v60 }
  0x6d   : > { %v818_v25 = vadd.f32 %v782_v52, %v696_v0  ;;  %v3256_v38 = vadd.f32 %v1309_v33, %v1238_v57  ;;  %v1057_v35 = vsel %vm749_vm2, %v1055_v18, %v4211_v55  ;;  %v3263_v42 = vmul.f32 %v2723_v24, %v3197_v41 }
  0x6e   : > { %4288 = vst [vmem:[#allocation25_spill] sm:$0xff] %v3252_v31  ;;  %v1209_v40 = vrot.slane %v1149_v61, 1  ;;  %v4214_v62 = vrot.slane %v3252_v31, 1  ;;  %v1330_v10 = vrot.slane %v1270_v1, 2  ;;  %v554_v0 = vmul.f32 %v2683_v4, %v2735_v28 }
  0x6f   : > { %4289 = vst [vmem:[#allocation26_spill] sm:$0xff] %v3256_v38  ;;  %v851_v56 = vadd.f32 %v835_v34, %v818_v25  ;;  %1390 = vperm.xlu1 %2412, %v3256_v38   ;;  %v4218_v33 = vrot.slane %v3263_v42, 2  ;;  %v591_v52 = vmul.f32 %v2685_v5, %v2735_v28  ;;  %v713_v57 = vmul.f32 %v2687_v6, %v2735_v28 }
  0x70   : > { %4290 = vst [vmem:[#allocation27_spill] sm:$0xff] %v3263_v42  ;;  %v831_v34 = vmul.f32 %v2694_v7, %v2750_v32  ;;  %v1211_v61 = vsel %vm627_vm1, %v1209_v40, %v4214_v62  ;;  %v868_v25 = vmul.f32 %v2696_v8, %v2750_v32  ;;  %v989_v1 = vmul.f32 %v2698_v9, %v2750_v32 }
  0x71   : > { %v972_v18 = vadd.f32 %v936_v58, %v851_v56  ;;  %v1332_v55 = vsel %vm749_vm2, %v1330_v10, %v4218_v33  ;;  %v648_v28 = vrot.slane %v591_v52, 1  ;;  %v770_v48 = vrot.slane %v713_v57, 2 }
  0x72   : > { %v1106_v58 = vmul.f32 %v2706_v13, %v3001_v20  ;;  %v924_v19 = vrot.slane %v868_v25, 1  ;;  %v1045_v40 = vrot.slane %v989_v1, 2  ;;  %v1143_v62 = vmul.f32 %v2708_v14, %v3001_v20 }
  0x73   : > { %v1093_v56 = vadd.f32 %v1057_v35, %v972_v18  ;;  %v4291_v49 = vrot.slane %v3021_v17, 1  ;;  %v4292_v15 = vrot.slane %v3027_v22, 2  ;;  %v1264_v52 = vmul.f32 %v2723_v24, %v3001_v20 }
  0x74   : > { %v553_v57 = vmul.f32 %v2683_v4, %v2729_v26  ;;  %v4293_v25 = vrot.slane %v3035_v23, 1  ;;  %v4294_v17 = vrot.slane %v3044_v2, 2  ;;  %v1199_v22 = vrot.slane %v1143_v62, 1 }
  0x75   : > { %v650_v59 = vsel %vm627_vm1, %v648_v28, %v4291_v49  ;;  %v772_v10 = vsel %vm749_vm2, %v770_v48, %v4292_v15  ;;  %v1126_v35 = vadd.f32 %v1110_v46, %v1093_v56  ;;  %v1320_v28 = vrot.slane %v1264_v52, 2 }
  0x76   : > { %v692_v18 = vadd.f32 %v650_v59, %v554_v0  ;;  %v926_v1 = vsel %vm627_vm1, %v924_v19, %v4293_v25  ;;  %v1047_v49 = vsel %vm749_vm2, %v1045_v40, %v4294_v17  ;;  %v590_v15 = vmul.f32 %v2685_v5, %v3087_v50  ;;  %v4302_v25 = vld [vmem:[#allocation7_spill] sm:$0xff] }
  0x77   : > { %v712_v48 = vmul.f32 %v2687_v6, %v3087_v50  ;;  %v1247_v26 = vadd.f32 %v1211_v61, %v1126_v35  ;;  %v830_v59 = vmul.f32 %v2694_v7, %v2742_v30  ;;  %v867_v23 = vmul.f32 %v2696_v8, %v2995_v27  ;;  %v4300_v35 = vld [vmem:[#allocation9_spill] sm:$0xff] }
  0x78   : > { %v814_v33 = vadd.f32 %v772_v10, %v692_v18  ;;  %v4295_v2 = vrot.slane %v3062_v29, 1  ;;  %v4296_v46 = vrot.slane %v3068_v47, 2  ;;  %v646_v0 = vrot.slane %v590_v15, 1  ;;  %v4298_v10 = vld [vmem:[#allocation8_spill] sm:$0xff] }
  0x79   : > { %v768_v56 = vrot.slane %v712_v48, 2  ;;  %v3322_v40 = vadd.f32 %v1332_v55, %v1247_v26  ;;  %v922_v61 = vrot.slane %v867_v23, 1  ;;  %v988_v30 = vmul.f32 %v2698_v9, %v2995_v27  ;;  %v4304_v27 = vld [vmem:[#allocation10_spill] sm:$0xff] }
  0x7a   : > { %v1201_v19 = vsel %vm627_vm1, %v1199_v22, %v4295_v2  ;;  %v1322_v62 = vsel %vm749_vm2, %v1320_v28, %v4296_v46  ;;  %v847_v50 = vadd.f32 %v831_v34, %v814_v33  ;;  %v4299_v52 = vrot.slane %v4298_v10, 1  ;;  %v4303_v22 = vld [vmem:[#allocation18_spill] sm:$0xff]  ;;  %v4309_v10 = vld [vmem:[#allocation12_spill] sm:$0xff] }
  0x7b   : > { %4297 = vst [vmem:[#allocation28_spill] sm:$0xff] %v3322_v40  ;;  %v4301_v18 = vrot.slane %v4300_v35, 2  ;;  %v1105_v17 = vmul.f32 %v2706_v13, %v4302_v25  ;;  %v1142_v55 = vmul.f32 %v2708_v14, %v4303_v22  ;;  %1435 = vperm.xlu0 %2414, %v3322_v40   ;;  %v4305_v28 = vrot.slane %v4304_v27, 1  ;;  %v4317_v40 = vld [vmem:[#allocation14_spill] sm:$0xff] }
  0x7c   : > { %v647_v29 = vsel %vm627_vm1, %v4299_v52, %v646_v0  ;;  %v968_v33 = vadd.f32 %v926_v1, %v847_v50  ;;  %v1043_v48 = vrot.slane %v988_v30, 2  ;;  %v1263_v23 = vmul.f32 %v2723_v24, %v4303_v22 }
  0x7d   : > { %v769_v47 = vsel %vm749_vm2, %v4301_v18, %v768_v56  ;;  %v691_v34 = vadd.f32 %v647_v29, %v553_v57  ;;  %v923_v15 = vsel %vm627_vm1, %v4305_v28, %v922_v61  ;;  %v1197_v26 = vrot.slane %v1142_v55, 1  ;;  %v4307_v56 = vld [vmem:[#allocation11_spill] sm:$0xff] }
  0x7e   : > { %v4306_v2 = vrot.slane %v3160_v11, 7  ;;  %v557_v0 = vmul.f32 %v2683_v4, %v4302_v25  ;;  %v1089_v57 = vadd.f32 %v1047_v49, %v968_v33  ;;  %v4308_v50 = vrot.slane %v4307_v56, 2 }
  0x7f   : > { %v813_v1 = vadd.f32 %v769_v47, %v691_v34  ;;  %v3355_v30 = vmul.f32 %v2685_v5, %v4302_v25  ;;  %v4310_v11 = vrot.slane %v4309_v10, 1  ;;  %v1318_v29 = vrot.slane %v1263_v23, 2  ;;  %v4311_v34 = vld [vmem:[#allocation13_spill] sm:$0xff] }
  0x80   : > { %v3345_v46 = vsel %vm461_vm0, %v4306_v2, 0.0  ;;  %v1044_v61 = vsel %vm749_vm2, %v4308_v50, %v1043_v48  ;;  %v596_v35 = vmul.f32 %v2685_v5, %v4303_v22  ;;  %v3365_v49 = vmul.f32 %v2687_v6, %v4302_v25 }
  0x81   : > { %v1198_v52 = vsel %vm627_vm1, %v4310_v11, %v1197_v26  ;;  %v1122_v18 = vadd.f32 %v1106_v58, %v1089_v57  ;;  %v846_v47 = vadd.f32 %v830_v59, %v813_v1  ;;  %v4225_v55 = vrot.slane %v3355_v30, 1  ;;  %v4313_v57 = vld [vmem:[#allocation19_spill] sm:$0xff] }
  0x82   : > { %v718_v33 = vmul.f32 %v2687_v6, %v4303_v22  ;;  %v4312_v27 = vrot.slane %v4311_v34, 2  ;;  %v656_v48 = vrot.slane %v596_v35, 1  ;;  %v4221_v26 = vrot.slane %v3365_v49, 2  ;;  %v3412_v35 = vld [vmem:[%s402_s29 + $0x8] sm:%s2431_s17] }
  0x83   : > { %v834_v25 = vmul.f32 %v2694_v7, %v3012_v21  ;;  %v1243_v58 = vadd.f32 %v1201_v19, %v1122_v18  ;;  %v967_v59 = vadd.f32 %v923_v15, %v846_v47  ;;  %v3383_v22 = vmul.f32 %v2696_v8, %v3012_v21 }
  0x84   : > { %v1319_v28 = vsel %vm749_vm2, %v4312_v27, %v1318_v29  ;;  %v778_v23 = vrot.slane %v718_v33, 2  ;;  %v657_v2 = vsel %vm627_vm1, %v4225_v55, %v656_v48  ;;  %v873_v1 = vmul.f32 %v2696_v8, %v4313_v57  ;;  %v3410_v29 = vld [vmem:[%s402_s29] sm:%s2431_s17]  ;;  %s2540_s17 = smov 8   ;;  %s2543_s29 = smov 20  }
  0x85   : > { %v3396_v56 = vmul.f32 %v2698_v9, %v3012_v21  ;;  %v994_v19 = vmul.f32 %v2698_v9, %v4313_v57  ;;  %v3405_v15 = vadd.f32 %v1322_v62, %v1243_v58  ;;  %v1088_v50 = vadd.f32 %v1044_v61, %v967_v59  ;;  %v2426_v48 = vld [vmem:[%s385_s16] sm:%s3387_s7] }
  0x86   : > { %v695_v10 = vadd.f32 %v657_v2, %v557_v0  ;;  %v779_v11 = vsel %vm749_vm2, %v4221_v26, %v778_v23  ;;  %v4220_v18 = vrot.slane %v3383_v22, 1  ;;  %v932_v47 = vrot.slane %v873_v1, 1 }
  0x87   : > { %4314 = vst [vmem:[#allocation8_spill] sm:$0xff] %v3405_v15  ;;  %v4219_v33 = vrot.slane %v3396_v56, 2  ;;  %v1053_v34 = vrot.slane %v994_v19, 2  ;;  %1415 = vperm.xlu2 %2413, %v3405_v15   ;;  %v1121_v62 = vadd.f32 %v1105_v17, %v1088_v50  ;;  %v1109_v0 = vmul.f32 %v2706_v13, %v3186_v63 }
  0x88   : > { %v817_v61 = vadd.f32 %v779_v11, %v695_v10  ;;  %v3421_v27 = vmul.f32 %v2708_v14, %v3186_v63  ;;  %v933_v58 = vsel %vm627_vm1, %v4220_v18, %v932_v47  ;;  %v1148_v17 = vmul.f32 %v2708_v14, %v3345_v46  ;;  %v3440_v10 = vld [vmem:[%s385_s16 + $0x8] sm:%s3387_s7]  ;;  %s2544_s7 = smov 16   ;;  %s2547_s16 = smov 32  }
  0x89   : > { %v1054_v59 = vsel %vm749_vm2, %v4219_v33, %v1053_v34  ;;  %v3434_v23 = vmul.f32 %v2723_v24, %v3186_v63  ;;  %v1242_v2 = vadd.f32 %v1198_v52, %v1121_v62  ;;  %v1269_v50 = vmul.f32 %v2723_v24, %v3345_v46 }
  0x8a   : > { %v850_v1 = vadd.f32 %v834_v25, %v817_v61  ;;  %v4224_v19 = vrot.slane %v3421_v27, 1  ;;  %v1207_v11 = vrot.slane %v1148_v17, 1  ;;  %v462_v34 = vrot.slane %v2426_v48, 7 }
  0x8b   : > { %v4222_v47 = vrot.slane %v3434_v23, 2  ;;  %v3443_v33 = vadd.f32 %v1319_v28, %v1242_v2  ;;  %v1328_v26 = vrot.slane %v1269_v50, 2  ;;  %v4223_v25 = vrot.slane %v3440_v10, 7 }
  0x8c   : > { %v971_v18 = vadd.f32 %v933_v58, %v850_v1  ;;  %v1208_v52 = vsel %vm627_vm1, %v4224_v19, %v1207_v11  ;;  %v522_v62 = vsel %vm461_vm0, 0.0, %v462_v34  ;;  %v4316_v1 = vld [vmem:[#allocation16_spill] sm:$0xff]  ;;  %v1131_v51 = vmul.f32 %v2708_v14, %v4317_v40 }
  0x8d   : > { %4315 = vst [vmem:[#allocation9_spill] sm:$0xff] %v3443_v33  ;;  %1410 = vperm.xlu1 %2412, %v3443_v33   ;;  %v1329_v17 = vsel %vm749_vm2, %v4222_v47, %v1328_v26  ;;  %v546_v28 = vmul.f32 %v2683_v4, %v522_v62  ;;  %v579_v48 = vmul.f32 %v2685_v5, %v522_v62 }
  0x8e   : > { %v1092_v61 = vadd.f32 %v1054_v59, %v971_v18  ;;  %v3459_v58 = vsel %vm461_vm0, %v462_v34, %v4223_v25  ;;  %v701_v2 = vmul.f32 %v2687_v6, %v522_v62  ;;  %v856_v50 = vmul.f32 %v2696_v8, %v4316_v1 }
  0x8f   : > { %v3466_v18 = vmul.f32 %v2696_v8, %v2929_v39  ;;  %v3470_v26 = vmul.f32 %v2685_v5, %v3459_v58  ;;  %v628_v11 = vrot.slane %v579_v48, 1  ;;  %v3474_v47 = vmul.f32 %v2687_v6, %v3459_v58 }
  0x90   : > { %v1125_v59 = vadd.f32 %v1109_v0, %v1092_v61  ;;  %v750_v34 = vrot.slane %v701_v2, 2  ;;  %v904_v25 = vrot.slane %v856_v50, 1  ;;  %v977_v19 = vmul.f32 %v2698_v9, %v4316_v1 }
  0x91   : > { %v4236_v62 = vrot.slane %v3466_v18, 1  ;;  %v4238_v15 = vrot.slane %v3470_v26, 1  ;;  %v4237_v0 = vrot.slane %v3474_v47, 2  ;;  %v3483_v61 = vmul.f32 %v2698_v9, %v2929_v39 }
  0x92   : > { %v1246_v55 = vadd.f32 %v1208_v52, %v1125_v59  ;;  %v823_v48 = vmul.f32 %v2694_v7, %v4316_v1  ;;  %v1025_v50 = vrot.slane %v977_v19, 2  ;;  %v3505_v19 = vmul.f32 %v2708_v14, %v2832_v12 }
  0x93   : > { %v906_v2 = vsel %vm627_vm1, %v904_v25, %v4236_v62  ;;  %v630_v59 = vsel %vm627_vm1, %v628_v11, %v4238_v15  ;;  %v752_v33 = vsel %vm749_vm2, %v750_v34, %v4237_v0  ;;  %v4245_v1 = vrot.slane %v3483_v61, 2 }
  0x94   : > { %v3492_v52 = vadd.f32 %v1329_v17, %v1246_v55  ;;  %v684_v3 = vadd.f32 %v630_v59, %v546_v28  ;;  %v1098_v25 = vmul.f32 %v2706_v13, %v4317_v40  ;;  %v1252_v55 = vmul.f32 %v2723_v24, %v4317_v40 }
  0x95   : > { %v1179_v17 = vrot.slane %v1131_v51, 1  ;;  %v3512_v11 = vmul.f32 %v2723_v24, %v2832_v12  ;;  %v556_v28 = vmul.f32 %v2683_v4, %v2750_v32  ;;  %v594_v34 = vmul.f32 %v2685_v5, %v2750_v32 }
  0x96   : > { %4318 = vst [vmem:[#allocation7_spill] sm:$0xff] %v3492_v52  ;;  %1430 = vperm.xlu2 %2413, %v3492_v52   ;;  %v806_v59 = vadd.f32 %v752_v33, %v684_v3  ;;  %v1180_v62 = vrot.slane %v3505_v19, 1  ;;  %v1300_v0 = vrot.slane %v1252_v55, 2  ;;  %v716_v40 = vmul.f32 %v2687_v6, %v2750_v32 }
  0x97   : > { %v1027_v51 = vsel %vm749_vm2, %v1025_v50, %v4245_v1  ;;  %v4248_v15 = vrot.slane %v3512_v11, 2  ;;  %v653_v52 = vrot.slane %v594_v34, 1  ;;  %v871_v38 = vmul.f32 %v2696_v8, %v3001_v20 }
  0x98   : > { %v839_v42 = vadd.f32 %v823_v48, %v806_v59  ;;  %v775_v31 = vrot.slane %v716_v40, 2  ;;  %v833_v3 = vmul.f32 %v2694_v7, %v3001_v20  ;;  %v992_v33 = vmul.f32 %v2698_v9, %v3001_v20 }
  0x99   : > { %v1181_v32 = vsel %vm627_vm1, %v1179_v17, %v1180_v62  ;;  %v1302_v50 = vsel %vm749_vm2, %v1300_v0, %v4248_v15  ;;  %v4319_v55 = vrot.slane %v3355_v30, 1  ;;  %v929_v48 = vrot.slane %v871_v38, 1 }
  0x9a   : > { %v960_v59 = vadd.f32 %v906_v2, %v839_v42  ;;  %v4320_v1 = vrot.slane %v3365_v49, 2  ;;  %v1050_v20 = vrot.slane %v992_v33, 2  ;;  %v1108_v37 = vmul.f32 %v2706_v13, %v3189_v53 }
  0x9b   : > { %v655_v34 = vsel %vm627_vm1, %v653_v52, %v4319_v55  ;;  %v1146_v17 = vmul.f32 %v2708_v14, %v3189_v53  ;;  %v1267_v0 = vmul.f32 %v2723_v24, %v3189_v53  ;;  %v4321_v38 = vrot.slane %v3383_v22, 1 }
  0x9c   : > { %v694_v40 = vadd.f32 %v655_v34, %v556_v28  ;;  %v777_v45 = vsel %vm749_vm2, %v775_v31, %v4320_v1  ;;  %v1081_v30 = vadd.f32 %v1027_v51, %v960_v59  ;;  %v489_v31 = vrot.slane %v3410_v29, 7 }
  0x9d   : > { %v931_v42 = vsel %vm627_vm1, %v929_v48, %v4321_v38  ;;  %v1204_v2 = vrot.slane %v1146_v17, 1  ;;  %v1325_v49 = vrot.slane %v1267_v0, 2  ;;  %v490_v52 = vrot.slane %v3412_v35, 7 }
  0x9e   : > { %v816_v15 = vadd.f32 %v777_v45, %v694_v40  ;;  %v1114_v1 = vadd.f32 %v1098_v25, %v1081_v30  ;;  %v4322_v33 = vrot.slane %v3396_v56, 2  ;;  %v600_v51 = vmul.f32 %v2685_v5, %v3189_v53 }
  0x9f   : > { %v4323_v45 = vrot.slane %v3421_v27, 1  ;;  %v4324_v34 = vrot.slane %v3434_v23, 2  ;;  %v3568_v29 = vsel %vm461_vm0, %v489_v31, %v490_v52  ;;  %v560_v56 = vmul.f32 %v2683_v4, %v3189_v53 }
  0xa0   : > { %v849_v28 = vadd.f32 %v833_v3, %v816_v15  ;;  %v1052_v55 = vsel %vm749_vm2, %v1050_v20, %v4322_v33  ;;  %v1235_v15 = vadd.f32 %v1181_v32, %v1114_v1  ;;  %v3574_v3 = vmul.f32 %v2685_v5, %v3186_v63 }
  0xa1   : > { %v1206_v22 = vsel %vm627_vm1, %v1204_v2, %v4323_v45  ;;  %v1327_v48 = vsel %vm749_vm2, %v1325_v49, %v4324_v34  ;;  %v663_v27 = vrot.slane %v600_v51, 1  ;;  %v531_v59 = vsel %vm461_vm0, 0.0, %v489_v31 }
  0xa2   : > { %v970_v25 = vadd.f32 %v931_v42, %v849_v28  ;;  %v722_v23 = vmul.f32 %v2687_v6, %v3189_v53  ;;  %v3581_v40 = vmul.f32 %v2687_v6, %v3186_v63  ;;  %v877_v20 = vmul.f32 %v2696_v8, %v3200_v60 }
  0xa3   : > { %v3585_v17 = vadd.f32 %v1302_v50, %v1235_v15  ;;  %v664_v0 = vrot.slane %v3574_v3, 1  ;;  %v3590_v30 = vmul.f32 %v2696_v8, %v3197_v41  ;;  %v998_v2 = vmul.f32 %v2698_v9, %v3200_v60 }
  0xa4   : > { %v1091_v32 = vadd.f32 %v1052_v55, %v970_v25  ;;  %v785_v38 = vrot.slane %v722_v23, 2  ;;  %v786_v42 = vrot.slane %v3581_v40, 2  ;;  %v939_v53 = vrot.slane %v877_v20, 1 }
  0xa5   : > { %1375 = vperm.xlu0 %2414, %v3585_v17   ;;  %v665_v50 = vsel %vm627_vm1, %v663_v27, %v664_v0  ;;  %v940_v31 = vrot.slane %v3590_v30, 1  ;;  %v3602_v1 = vmul.f32 %v2698_v9, %v3197_v41  ;;  %v837_v55 = vmul.f32 %v2694_v7, %v3200_v60 }
  0xa6   : > { %v1124_v49 = vadd.f32 %v1108_v37, %v1091_v32  ;;  %v698_v28 = vadd.f32 %v665_v50, %v560_v56  ;;  %v787_v33 = vsel %vm749_vm2, %v785_v38, %v786_v42  ;;  %v1060_v51 = vrot.slane %v998_v2, 2 }
  0xa7   : > { %v1061_v45 = vrot.slane %v3602_v1, 2  ;;  %v1112_v34 = vmul.f32 %v2706_v13, %v531_v59  ;;  %v1152_v15 = vmul.f32 %v2708_v14, %v531_v59  ;;  %v3614_v27 = vmul.f32 %v2708_v14, %v3568_v29 }
  0xa8   : > { %v1245_v37 = vadd.f32 %v1206_v22, %v1124_v49  ;;  %v820_v25 = vadd.f32 %v787_v33, %v698_v28  ;;  %v1273_v56 = vmul.f32 %v2723_v24, %v531_v59  ;;  %v3619_v23 = vmul.f32 %v2723_v24, %v3568_v29 }
  0xa9   : > { %v941_v22 = vsel %vm627_vm1, %v939_v53, %v940_v31  ;;  %v1214_v20 = vrot.slane %v1152_v15, 1  ;;  %v4325_v32 = vrot.slane %v3440_v10, 7  ;;  %v1215_v49 = vrot.slane %v3614_v27, 1 }
  0xaa   : > { %v3621_v60 = vadd.f32 %v1327_v48, %v1245_v37  ;;  %v853_v2 = vadd.f32 %v837_v55, %v820_v25  ;;  %v1335_v50 = vrot.slane %v1273_v56, 2  ;;  %v4249_v59 = vrot.slane %v3619_v23, 2 }
  0xab   : > { %v532_v38 = vsel %vm461_vm0, %v4325_v32, 0.0  ;;  %v1062_v48 = vsel %vm749_vm2, %v1060_v51, %v1061_v45  ;;  %v547_v53 = vmul.f32 %v2683_v4, %v3459_v58  ;;  %v1216_v55 = vsel %vm627_vm1, %v1214_v20, %v1215_v49 }
  0xac   : > { %1425 = vperm.xlu1 %2412, %v3621_v60   ;;  %v581_v28 = vmul.f32 %v2685_v5, %v532_v38  ;;  %v703_v10 = vmul.f32 %v2687_v6, %v532_v38  ;;  %v974_v33 = vadd.f32 %v941_v22, %v853_v2  ;;  %v1337_v37 = vsel %vm749_vm2, %v1335_v50, %v4249_v59 }
  0xad   : > { %v858_v15 = vmul.f32 %v2696_v8, %v3123_v43  ;;  %v979_v58 = vmul.f32 %v2698_v9, %v3123_v43  ;;  %v4326_v22 = vrot.slane %v3470_v26, 1  ;;  %v4327_v20 = vrot.slane %v3474_v47, 2 }
  0xae   : > { %v631_v51 = vrot.slane %v581_v28, 1  ;;  %v753_v25 = vrot.slane %v703_v10, 2  ;;  %v1095_v56 = vadd.f32 %v1062_v48, %v974_v33  ;;  %v1133_v50 = vmul.f32 %v2708_v14, %v3075_v36 }
  0xaf   : > { %v907_v32 = vrot.slane %v858_v15, 1  ;;  %v1254_v28 = vmul.f32 %v2723_v24, %v3075_v36  ;;  %v824_v43 = vmul.f32 %v2694_v7, %v2929_v39  ;;  %v1099_v26 = vmul.f32 %v2706_v13, %v2832_v12 }
  0xb0   : > { %v632_v38 = vsel %vm627_vm1, %v4326_v22, %v631_v51  ;;  %v754_v2 = vsel %vm749_vm2, %v4327_v20, %v753_v25  ;;  %v1128_v10 = vadd.f32 %v1112_v34, %v1095_v56  ;;  %v4328_v48 = vrot.slane %v3466_v18, 1 }
  0xb1   : > { %v685_v59 = vadd.f32 %v632_v38, %v547_v53  ;;  %v1028_v33 = vrot.slane %v979_v58, 2  ;;  %v4329_v15 = vrot.slane %v3168_v44, 7  ;;  %v599_v36 = vmul.f32 %v2685_v5, %v4313_v57 }
  0xb2   : > { %v908_v47 = vsel %vm627_vm1, %v4328_v48, %v907_v32  ;;  %v1249_v34 = vadd.f32 %v1216_v55, %v1128_v10  ;;  %v559_v39 = vmul.f32 %v2683_v4, %v3012_v21  ;;  %v721_v12 = vmul.f32 %v2687_v6, %v4313_v57 }
  0xb3   : > { %v540_v51 = vsel %vm461_vm0, %v4329_v15, 0.0  ;;  %v807_v53 = vadd.f32 %v754_v2, %v685_v59  ;;  %v1182_v25 = vrot.slane %v1133_v50, 1  ;;  %v1303_v18 = vrot.slane %v1254_v28, 2 }
  0xb4   : > { %v661_v56 = vrot.slane %v599_v36, 1  ;;  %v876_v58 = vmul.f32 %v2696_v8, %v3345_v46  ;;  %v3677_v44 = vadd.f32 %v1337_v37, %v1249_v34  ;;  %v783_v22 = vrot.slane %v721_v12, 2 }
  0xb5   : > { %v840_v32 = vadd.f32 %v824_v43, %v807_v53  ;;  %v997_v55 = vmul.f32 %v2698_v9, %v3345_v46  ;;  %v4330_v59 = vrot.slane %v3483_v61, 2  ;;  %v4331_v38 = vrot.slane %v3208_v16, 1 }
  0xb6   : > { %v937_v20 = vrot.slane %v876_v58, 1  ;;  %v1151_v2 = vmul.f32 %v2708_v14, %v540_v51  ;;  %1445 = vperm.xlu2 %2413, %v3677_v44   ;;  %v4332_v28 = vrot.slane %v3214_v54, 2  ;;  %v836_v61 = vmul.f32 %v2694_v7, %v3186_v63  ;;  %v4334_v54 = vld [vmem:[#allocation23_spill] sm:$0xff]  ;;  %v4336_v58 = vld [vmem:[#allocation24_spill] sm:$0xff] }
  0xb7   : > { %v1029_v21 = vsel %vm749_vm2, %v4330_v59, %v1028_v33  ;;  %v662_v57 = vsel %vm627_vm1, %v4331_v38, %v661_v56  ;;  %v961_v37 = vadd.f32 %v908_v47, %v840_v32  ;;  %v1183_v16 = vsel %vm627_vm1, %v1180_v62, %v1182_v25 }
  0xb8   : > { %v697_v50 = vadd.f32 %v662_v57, %v559_v39  ;;  %v784_v10 = vsel %vm749_vm2, %v4332_v28, %v783_v22  ;;  %v4333_v43 = vrot.slane %v3512_v11, 2  ;;  %v1058_v33 = vrot.slane %v997_v55, 2 }
  0xb9   : > { %v1111_v47 = vmul.f32 %v2706_v13, %v3197_v41  ;;  %v1082_v15 = vadd.f32 %v1029_v21, %v961_v37  ;;  %v4335_v34 = vrot.slane %v4334_v54, 1  ;;  %v1272_v39 = vmul.f32 %v2723_v24, %v540_v51  ;;  %v4348_v54 = vld [vmem:[#allocation9_spill] sm:$0xff] }
  0xba   : > { %v1304_v48 = vsel %vm749_vm2, %v4333_v43, %v1303_v18  ;;  %v819_v36 = vadd.f32 %v784_v10, %v697_v50  ;;  %v1212_v12 = vrot.slane %v1151_v2, 1  ;;  %v541_v62 = vsel %vm461_vm0, %v490_v52, 0.0  ;;  %v4340_v50 = vld [vmem:[#allocation27_spill] sm:$0xff] }
  0xbb   : > { %v938_v53 = vsel %vm627_vm1, %v4335_v34, %v937_v20  ;;  %v602_v19 = vmul.f32 %v2685_v5, %v3345_v46  ;;  %v1115_v11 = vadd.f32 %v1099_v26, %v1082_v15  ;;  %v561_v18 = vmul.f32 %v2683_v4, %v3186_v63  ;;  %v4338_v20 = vld [vmem:[#allocation25_spill] sm:$0xff]  ;;  %v4349_v34 = vld [vmem:[#allocation22_spill] sm:$0xff] }
  0xbc   : > { %v852_v25 = vadd.f32 %v836_v61, %v819_v36  ;;  %v724_v56 = vmul.f32 %v2687_v6, %v3345_v46  ;;  %v4337_v32 = vrot.slane %v4336_v58, 2  ;;  %v879_v35 = vmul.f32 %v2696_v8, %v540_v51  ;;  %v4343_v15 = vld [vmem:[#allocation17_spill] sm:$0xff] }
  0xbd   : > { %v666_v55 = vrot.slane %v602_v19, 1  ;;  %v1000_v52 = vmul.f32 %v2698_v9, %v540_v51  ;;  %v1236_v59 = vadd.f32 %v1183_v16, %v1115_v11  ;;  %v1333_v5 = vrot.slane %v1272_v39, 2  ;;  %v4351_v39 = vld [vmem:[#allocation8_spill] sm:$0xff] }
  0xbe   : > { %v1059_v22 = vsel %vm749_vm2, %v4337_v32, %v1058_v33  ;;  %v973_v21 = vadd.f32 %v938_v53, %v852_v25  ;;  %v788_v26 = vrot.slane %v724_v56, 2  ;;  %v838_v6 = vmul.f32 %v2694_v7, %v3197_v41  ;;  %v4350_v53 = vld [vmem:[#allocation28_spill] sm:$0xff]  ;;  %v1406_v56 = vpop.permute.xlu0 %1405 }
  0xbf   : > { %v667_v4 = vsel %vm627_vm1, %v664_v0, %v666_v55  ;;  %v942_v63 = vrot.slane %v879_v35, 1  ;;  %v1154_v46 = vmul.f32 %v2708_v14, %v541_v62  ;;  %v3726_v38 = vadd.f32 %v1304_v48, %v1236_v59  ;;  %v3803_v59 = vld [vmem:[%s4156_s4] sm:$0xf] }
  0xc0   : > { %v1094_v57 = vadd.f32 %v1059_v22, %v973_v21  ;;  %v2534_v8 = vmov 1   ;;  %v699_v9 = vadd.f32 %v667_v4, %v561_v18  ;;  %v789_v51 = vsel %vm749_vm2, %v786_v42, %v788_v26 }
  0xc1   : > { %2416 = vset.pattern.permute.xlu2 %v2534_v8  ;;  %v4339_v3 = vrot.slane %v4338_v20, 1  ;;  %v1063_v2 = vrot.slane %v1000_v52, 2  ;;  %v1217_v37 = vrot.slane %v1154_v46, 1  ;;  %v1275_v7 = vmul.f32 %v2723_v24, %v541_v62  ;;  %1380 = vperm.xlu0 %2414, %v3726_v38   ;;  %v4352_v62 = vld [vmem:[#allocation7_spill] sm:$0xff] }
  0xc2   : > { %v1127_v14 = vadd.f32 %v1111_v47, %v1094_v57  ;;  %v821_v41 = vadd.f32 %v789_v51, %v699_v9  ;;  %1491 = vperm.xlu2 %2416, %v3726_v38   ;;  %v4341_v28 = vrot.slane %v4340_v50, 2  ;;  %v943_v42 = vsel %vm627_vm1, %v940_v31, %v942_v63  ;;  %v3792_v58 = vpop.permute.xlu1 %1385 }
  0xc3   : > { %v1213_v0 = vsel %vm627_vm1, %v4339_v3, %v1212_v12  ;;  %v1218_v10 = vsel %vm627_vm1, %v1215_v49, %v1217_v37  ;;  %v1338_v61 = vrot.slane %v1275_v7, 2  ;;  %v1064_v43 = vsel %vm749_vm2, %v1061_v45, %v1063_v2  ;;  %v4344_v45 = vld [vmem:[#allocation15_spill] sm:$0xff]  ;;  %v1396_v12 = vpop.permute.xlu2 %1395 }
  0xc4   : > { %v1334_v40 = vsel %vm749_vm2, %v4341_v28, %v1333_v5  ;;  %v1248_v24 = vadd.f32 %v1213_v0, %v1127_v14  ;;  %v854_v16 = vadd.f32 %v838_v6, %v821_v41  ;;  %v4342_v48 = vrot.slane %v3619_v23, 2  ;;  %v4345_v23 = vld [vmem:[#allocation20_spill] sm:$0xff] }
  0xc5   : > { %v1113_v31 = vmul.f32 %v2706_v13, %v3568_v29  ;;  %v4346_v13 = vld [vmem:[#allocation26_spill] sm:$0xff]  ;;  %v4347_v29 = vld [vmem:[#allocation21_spill] sm:$0xff]  ;;  %v2535_v19 = vmov 2   ;;  %v2536_v55 = vmov 3   ;;  %v3806_v5 = vperm.slane %v3803_v59, 1 }
  0xc6   : > { %v1339_v33 = vsel %vm749_vm2, %v4342_v48, %v1338_v61  ;;  %v3752_v47 = vadd.f32 %v1334_v40, %v1248_v24  ;;  %v975_v30 = vadd.f32 %v943_v42, %v854_v16  ;;  %v3810_v26 = vperm.slane %v3803_v59, 0 }
  0xc7   : > { %vm2122_vm0 = vcmask 424960   ;;  %vm2124_vm1 = vcmask 457728   ;;  %vm2126_vm2 = vcmask 490496  }
  0xc8   : > { %1440 = vperm.xlu1 %2412, %v3752_v47   ;;  %v1096_v27 = vadd.f32 %v1064_v43, %v975_v30 }
  0xca   : > { %v1129_v49 = vadd.f32 %v1113_v31, %v1096_v27  ;;  %1503 = vperm.xlu2 %2416, %v4343_v15  }
  0xcb   : > { %v3775_v11 = vpop.permute.xlu2 %1400 }
  0xcc   : > { %v1250_v36 = vadd.f32 %v1218_v10, %v1129_v49  ;;  %v3855_v49 = vperm.slane %v3803_v59, 2 }
  0xce   : > { %v3758_v1 = vadd.f32 %v1339_v33, %v1250_v36  ;;  %v1456_v36 = vmul.f32 %v3810_v26, %v3792_v58 }
  0xcf   : > { %v1421_v22 = vpop.permute.xlu0 %1420 }
  0xd0   : > { %1450 = vperm.xlu0 %2414, %v3758_v1   ;;  %2415 = vset.pattern.permute.xlu1 %v2534_v8  ;;  %v1463_v37 = vmul.f32 %v3810_v26, %v1421_v22 }
  0xd1   : > { %1487 = vperm.xlu1 %2415, %v3585_v17  }
  0xd2   : > { %1511 = vperm.xlu2 %2416, %v4344_v45  }
  0xd8   : > { %2417 = vset.pattern.permute.xlu0 %v2534_v8 }
  0xd9   : > { %1495 = vperm.xlu0 %2417, %v4345_v23   ;;  %1499 = vperm.xlu1 %2415, %v4346_v13  }
  0xda   : > { %1523 = vperm.xlu2 %2416, %v4347_v29  }
  0xe1   : > { %1515 = vperm.xlu0 %2417, %v4348_v54   ;;  %1507 = vperm.xlu1 %2415, %v4349_v34   ;;  %v3780_v25 = vpop.permute.xlu2 %1415  ;;  %v1391_v35 = vpop.permute.xlu1 %1390 }
  0xe2   : > { %1535 = vperm.xlu2 %2416, %v4350_v53  }
  0xe9   : > { %1527 = vperm.xlu0 %2417, %v3621_v60   ;;  %1519 = vperm.xlu1 %2415, %v4351_v39  }
  0xea   : > { %1547 = vperm.xlu2 %2416, %v3758_v1  }
  0xed   : > { %v1436_v21 = vpop.permute.xlu0 %1435 }
  0xee   : > { %v1466_v40 = vmul.f32 %v3810_v26, %v1436_v21 }
  0xf0   : > { %v3785_v18 = vpop.permute.xlu2 %1430 }
  0xf1   : > { %1539 = vperm.xlu0 %2417, %v3752_v47   ;;  %1531 = vperm.xlu1 %2415, %v4352_v62  }
  0xf2   : > { %2420 = vset.pattern.permute.xlu2 %v2535_v19 }
  0xf3   : > { %1592 = vperm.xlu2 %2420, %v4345_v23  }
  0xf9   : > { %2418 = vset.pattern.permute.xlu0 %v2535_v19  ;;  %1543 = vperm.xlu1 %2415, %v3677_v44  }
  0xfa   : > { %1584 = vperm.xlu0 %2418, %v3585_v17  }
  0xfb   : > { %1600 = vperm.xlu2 %2420, %v4343_v15  }
  0xff   : > { %v1411_v63 = vpop.permute.xlu1 %1410 }
 0x101   : > { %2419 = vset.pattern.permute.xlu1 %v2535_v19  ;;  %v1461_v19 = vmul.f32 %v3810_v26, %v1411_v63 }
 0x102   : > { %1604 = vperm.xlu0 %2418, %v4349_v34   ;;  %1588 = vperm.xlu1 %2419, %v3726_v38  }
 0x103   : > { %1612 = vperm.xlu2 %2420, %v4348_v54  }
 0x10a   : > { %1616 = vperm.xlu0 %2418, %v4351_v39   ;;  %1596 = vperm.xlu1 %2419, %v4346_v13  }
 0x10b   : > { %1624 = vperm.xlu2 %2420, %v3621_v60  }
 0x110   : > { %v3794_v32 = vpop.permute.xlu2 %1445 }
 0x112   : > { %1628 = vperm.xlu0 %2418, %v4352_v62   ;;  %1608 = vperm.xlu1 %2419, %v4344_v45  }
 0x113   : > { %1636 = vperm.xlu2 %2420, %v3752_v47  }
 0x117   : > { %v1376_v57 = vpop.permute.xlu0 %1375 }
 0x118   : > { %v1454_v16 = vmul.f32 %v3810_v26, %v1376_v57 }
 0x11a   : > { %1640 = vperm.xlu0 %2418, %v3677_v44   ;;  %1620 = vperm.xlu1 %2419, %v4347_v29  }
 0x11b   : > { %2421 = vset.pattern.permute.xlu2 %v2536_v55 }
 0x11c   : > { %v1492_v52 = vpop.permute.xlu2 %1491  ;;  %1681 = vperm.xlu2 %2421, %v3585_v17   ;;  %v1458_v17 = vmul.f32 %v3810_v26, %v1396_v12 }
 0x11d   : > { %v1552_v3 = vmul.f32 %v3806_v5, %v1492_v52 }
 0x11e   : > { %v1426_v20 = vpop.permute.xlu1 %1425 }
 0x122   : > { %2422 = vset.pattern.permute.xlu0 %v2536_v55  ;;  %1632 = vperm.xlu1 %2419, %v4350_v53  }
 0x123   : > { %1685 = vperm.xlu0 %2422, %v3726_v38   ;;  %v1460_v38 = vmul.f32 %v3810_v26, %v1406_v56 }
 0x124   : > { %v1504_v4 = vpop.permute.xlu2 %1503  ;;  %1693 = vperm.xlu2 %2421, %v4346_v13  }
 0x125   : > { %v1555_v6 = vmul.f32 %v3806_v5, %v1504_v4  ;;  %v1464_v4 = vmul.f32 %v3810_v26, %v1426_v20 }
 0x127   : > { %v3816_v46 = vadd.f32 %v1555_v6, %v1458_v17 }
 0x12a   : > { %1644 = vperm.xlu1 %2419, %v3758_v1  }
 0x12b   : > { %1729 = vperm.xlu0 %2422, %v4350_v53  }
 0x12c   : > { %v1512_v8 = vpop.permute.xlu2 %1511  ;;  %1705 = vperm.xlu2 %2421, %v4344_v45   ;;  %v1457_v45 = vmul.f32 %v3810_v26, %v1391_v35 }
 0x12d   : > { %v1557_v9 = vmul.f32 %v3806_v5, %v1512_v8 }
 0x12f   : > { %v3823_v51 = vadd.f32 %v1557_v9, %v1460_v38  ;;  %v1465_v9 = vmul.f32 %v3810_v26, %v3785_v18 }
 0x132   : > { %2423 = vset.pattern.permute.xlu1 %v2536_v55 }
 0x133   : > { %1721 = vperm.xlu0 %2422, %v3621_v60   ;;  %1689 = vperm.xlu1 %2423, %v4345_v23   ;;  %v1381_v0 = vpop.permute.xlu0 %1380 }
 0x134   : > { %v1524_v2 = vpop.permute.xlu2 %1523  ;;  %1713 = vperm.xlu2 %2421, %v4351_v39   ;;  %v1455_v7 = vmul.f32 %v3810_v26, %v1381_v0 }
 0x135   : > { %v1560_v14 = vmul.f32 %v3806_v5, %v1524_v2 }
 0x136   : > { %v3832_v41 = vadd.f32 %v1552_v3, %v1455_v7 }
 0x137   : > { %v3834_v50 = vadd.f32 %v1560_v14, %v1463_v37  ;;  %v1468_v14 = vmul.f32 %v3810_v26, %v3794_v32 }
 0x13a   : > { %v1441_v28 = vpop.permute.xlu1 %1440 }
 0x13b   : > { %1725 = vperm.xlu0 %2422, %v4352_v62   ;;  %1697 = vperm.xlu1 %2423, %v4343_v15   ;;  %v1459_v62 = vmul.f32 %v3810_v26, %v3775_v11  ;;  %v1467_v3 = vmul.f32 %v3810_v26, %v1441_v28 }
 0x13c   : > { %v1536_v60 = vpop.permute.xlu2 %1535  ;;  %1709 = vperm.xlu2 %2421, %v4348_v54  }
 0x13d   : > { %v1563_v42 = vmul.f32 %v3806_v5, %v1536_v60 }
 0x13f   : > { %v3841_v10 = vadd.f32 %v1563_v42, %v1466_v40 }
 0x142   : > { %v1451_v61 = vpop.permute.xlu0 %1450 }
 0x143   : > { %1717 = vperm.xlu0 %2422, %v4347_v29   ;;  %1737 = vperm.xlu1 %2423, %v3677_v44   ;;  %v1488_v24 = vpop.permute.xlu1 %1487  ;;  %v1469_v33 = vmul.f32 %v3810_v26, %v1451_v61 }
 0x144   : > { %v1551_v43 = vmul.f32 %v3806_v5, %v1488_v24  ;;  %v1548_v48 = vpop.permute.xlu2 %1547  ;;  %1701 = vperm.xlu2 %2421, %v4349_v34  }
 0x145   : > { %v1566_v30 = vmul.f32 %v3806_v5, %v1548_v48 }
 0x146   : > { %v3850_v31 = vadd.f32 %v1551_v43, %v1454_v16 }
 0x147   : > { %v3852_v27 = vadd.f32 %v1566_v30, %v1469_v33 }
 0x14b   : > { %v1496_v44 = vpop.permute.xlu0 %1495  ;;  %1741 = vperm.xlu1 %2423, %v3758_v1   ;;  %v1500_v15 = vpop.permute.xlu1 %1499 }
 0x14c   : > { %v1553_v23 = vmul.f32 %v3806_v5, %v1496_v44  ;;  %v1554_v13 = vmul.f32 %v3806_v5, %v1500_v15 }
 0x14d   : > { %v1593_v29 = vpop.permute.xlu2 %1592 }
 0x14e   : > { %v1569_v54 = vadd.f32 %v1553_v23, %v1456_v36  ;;  %v1570_v34 = vadd.f32 %v1554_v13, %v1457_v45  ;;  %v1650_v53 = vmul.f32 %v3855_v49, %v1593_v29  ;;  %v3911_v36 = vperm.slane %v3803_v59, 3 }
 0x150   : > { %v3864_v39 = vadd.f32 %v1650_v53, %v1569_v54 }
 0x153   : > { %v1516_v12 = vpop.permute.xlu0 %1515  ;;  %1733 = vperm.xlu1 %2423, %v3752_v47   ;;  %v1508_v1 = vpop.permute.xlu1 %1507  ;;  %v1462_v47 = vmul.f32 %v3810_v26, %v3780_v25 }
 0x154   : > { %v1558_v56 = vmul.f32 %v3806_v5, %v1516_v12  ;;  %v1556_v58 = vmul.f32 %v3806_v5, %v1508_v1  ;;  %v3924_v12 = vld [vmem:[%s4157_s5] ss:$0 sm:$0xff] }
 0x155   : > { %v3872_v22 = vpop.permute.xlu2 %1600 }
 0x156   : > { %v1574_v55 = vadd.f32 %v1558_v56, %v1461_v19  ;;  %v3874_v35 = vadd.f32 %v1556_v58, %v1459_v62 }
 0x15b   : > { %v1528_v52 = vpop.permute.xlu0 %1527  ;;  %v1520_v21 = vpop.permute.xlu1 %1519 }
 0x15c   : > { %v1561_v11 = vmul.f32 %v3806_v5, %v1528_v52  ;;  %v1559_v17 = vmul.f32 %v3806_v5, %v1520_v21 }
 0x15d   : > { %v1613_v6 = vpop.permute.xlu2 %1612 }
 0x15e   : > { %v3881_v63 = vadd.f32 %v1561_v11, %v1464_v4  ;;  %v1575_v57 = vadd.f32 %v1559_v17, %v1462_v47 }
 0x163   : > { %v1540_v8 = vpop.permute.xlu0 %1539  ;;  %v1532_v38 = vpop.permute.xlu1 %1531 }
 0x164   : > { %v1564_v0 = vmul.f32 %v3806_v5, %v1540_v8  ;;  %v1562_v25 = vmul.f32 %v3806_v5, %v1532_v38 }
 0x165   : > { %v3888_v20 = vpop.permute.xlu2 %1624 }
 0x166   : > { %v3890_v2 = vadd.f32 %v1564_v0, %v1467_v3  ;;  %v3892_v37 = vadd.f32 %v1562_v25, %v1465_v9 }
 0x16b   : > { %v1544_v7 = vpop.permute.xlu1 %1543 }
 0x16c   : > { %v1565_v60 = vmul.f32 %v3806_v5, %v1544_v7  ;;  %v3897_v40 = vpop.permute.xlu0 %1584 }
 0x16d   : > { %v3899_v18 = vpop.permute.xlu2 %1636 }
 0x16e   : > { %v3901_v28 = vadd.f32 %v1565_v60, %v1468_v14 }
 0x174   : > { %v1605_v42 = vpop.permute.xlu0 %1604  ;;  %v1589_v61 = vpop.permute.xlu1 %1588 }
 0x175   : > { %v1649_v24 = vmul.f32 %v3855_v49, %v1589_v61  ;;  %v1653_v4 = vmul.f32 %v3855_v49, %v1605_v42 }
 0x176   : > { %v3904_v16 = vpop.permute.xlu2 %1681 }
 0x177   : > { %v1665_v43 = vadd.f32 %v1649_v24, %v3832_v41  ;;  %v1669_v3 = vadd.f32 %v1653_v4, %v3874_v35 }
 0x17c   : > { %v1617_v48 = vpop.permute.xlu0 %1616  ;;  %v1597_v33 = vpop.permute.xlu1 %1596 }
 0x17d   : > { %v1651_v32 = vmul.f32 %v3855_v49, %v1597_v33  ;;  %v1656_v29 = vmul.f32 %v3855_v49, %v1617_v48  ;;  %v2537_v33 = vmov 1983009808  }
 0x17e   : > { %v1694_v26 = vpop.permute.xlu2 %1693  ;;  %v1819_v35 = vunpack.c.l.s4 %v2537_v33 }
 0x17f   : > { %v1667_v5 = vadd.f32 %v1651_v32, %v1570_v34  ;;  %v1748_v13 = vmul.f32 %v3911_v36, %v1694_v26  ;;  %v1655_v34 = vmul.f32 %v3855_v49, %v1613_v6  ;;  %v1672_v59 = vadd.f32 %v1656_v29, %v1575_v57 }
 0x181   : > { %v1764_v54 = vadd.f32 %v1748_v13, %v1667_v5  ;;  %v1671_v21 = vadd.f32 %v1655_v34, %v1574_v55 }
 0x183   : > { %v1784_v62 = vadd.f32 %v3924_v12, %v1764_v54  ;;  %v1648_v54 = vmul.f32 %v3855_v49, %v3897_v40 }
 0x184   : > { %v3908_v30 = vpop.permute.xlu0 %1628  ;;  %v1609_v44 = vpop.permute.xlu1 %1608 }
 0x185   : > { %v1800_v11 = vmax.f32 %v1784_v62, 0.0  ;;  %v1654_v8 = vmul.f32 %v3855_v49, %v1609_v44  ;;  %v1745_v62 = vmul.f32 %v3911_v36, %v3904_v16  ;;  %v1659_v33 = vmul.f32 %v3855_v49, %v3908_v30 }
 0x186   : > { %v1706_v15 = vpop.permute.xlu2 %1705 }
 0x187   : > { %v1751_v0 = vmul.f32 %v3911_v36, %v1706_v15  ;;  %v1940_v25 = vrot.slane %v1800_v11, 4  ;;  %v1670_v42 = vadd.f32 %v1654_v8, %v3823_v51 }
 0x189   : > { %v1767_v44 = vadd.f32 %v1751_v0, %v1670_v42  ;;  %v1652_v0 = vmul.f32 %v3855_v49, %v3872_v22 }
 0x18c   : > { %v3913_v45 = vpop.permute.xlu0 %1640  ;;  %v3915_v23 = vpop.permute.xlu1 %1620 }
 0x18e   : > { %v1714_v41 = vpop.permute.xlu2 %1713 }
 0x18f   : > { %v1753_v53 = vmul.f32 %v3911_v36, %v1714_v41 }
 0x191   : > { %v1769_v58 = vadd.f32 %v1753_v53, %v1672_v59  ;;  %v3948_v53 = vunpack.c.0.s8 %v1819_v35  ;;  %v1787_v59 = vadd.f32 %v3924_v12, %v1767_v44 }
 0x193   : > { %v1789_v38 = vadd.f32 %v3924_v12, %v1769_v58 }
 0x194   : > { %v1633_v1 = vpop.permute.xlu1 %1632 }
 0x195   : > { %v1686_v19 = vpop.permute.xlu0 %1685  ;;  %v1660_v57 = vmul.f32 %v3855_v49, %v1633_v1 }
 0x196   : > { %v1746_v56 = vmul.f32 %v3911_v36, %v1686_v19  ;;  %v1710_v52 = vpop.permute.xlu2 %1709 }
 0x197   : > { %v1752_v47 = vmul.f32 %v3911_v36, %v1710_v52  ;;  %v1676_v61 = vadd.f32 %v1660_v57, %v3841_v10  ;;  %v1803_v57 = vmax.f32 %v1787_v59, 0.0  ;;  %v1662_v59 = vmul.f32 %v3855_v49, %v3913_v45 }
 0x198   : > { %v1762_v17 = vadd.f32 %v1746_v56, %v1665_v43  ;;  %v1805_v43 = vmax.f32 %v1789_v38, 0.0 }
 0x199   : > { %v1768_v6 = vadd.f32 %v1752_v47, %v1671_v21 }
 0x19a   : > { %v1782_v7 = vadd.f32 %v3924_v12, %v1762_v17  ;;  %v1840_v10 = vrot.slane %v1805_v43, 4  ;;  %v1664_v17 = vadd.f32 %v1648_v54, %v3850_v31  ;;  %v1675_v54 = vadd.f32 %v1659_v33, %v3892_v37 }
 0x19b   : > { %v1788_v9 = vadd.f32 %v3924_v12, %v1768_v6  ;;  %v1658_v6 = vmul.f32 %v3855_v49, %v3888_v20 }
 0x19c   : > { %v3936_v55 = vpop.permute.xlu1 %1644  ;;  %v1798_v13 = vmax.f32 %v1782_v7, 0.0 }
 0x19d   : > { %v1730_v14 = vpop.permute.xlu0 %1729  ;;  %v1804_v60 = vmax.f32 %v1788_v9, 0.0 }
 0x19e   : > { %v1757_v24 = vmul.f32 %v3911_v36, %v1730_v14  ;;  %v1702_v48 = vpop.permute.xlu2 %1701  ;;  %v1928_v19 = vrot.slane %v1798_v13, 4 }
 0x19f   : > { %v1938_v32 = vrot.slane %v1804_v60, 4  ;;  %v1941_v26 = vsel %vm1814_vm3, %v1804_v60, %v1940_v25  ;;  %v1750_v5 = vmul.f32 %v3911_v36, %v1702_v48  ;;  %v1761_v25 = vadd.f32 %v1745_v62, %v1664_v17 }
 0x1a0   : > { %v1773_v15 = vadd.f32 %v1757_v24, %v1676_v61  ;;  %v1949_v58 = vperm.slane %v1941_v26, %v3948_v53 }
 0x1a1   : > { %v1939_v41 = vsel %vm1814_vm3, %v1938_v32, %v1800_v11  ;;  %v1766_v29 = vadd.f32 %v1750_v5, %v1669_v3  ;;  %v1781_v35 = vadd.f32 %v3924_v12, %v1761_v25 }
 0x1a2   : > { %v1793_v51 = vadd.f32 %v3924_v12, %v1773_v15  ;;  %v1945_v40 = vperm.slane %v1939_v41, %v3948_v53  ;;  %v1986_v31 = vrot.slane %v1949_v58, 4  ;;  %v1668_v15 = vadd.f32 %v1652_v0, %v3816_v46 }
 0x1a3   : > { %v1786_v34 = vadd.f32 %v3924_v12, %v1766_v29 }
 0x1a4   : > { %v1809_v1 = vmax.f32 %v1793_v51, 0.0  ;;  %v1974_v42 = vrot.slane %v1945_v40, 4 }
 0x1a5   : > { %v1722_v56 = vpop.permute.xlu0 %1721  ;;  %v1690_v52 = vpop.permute.xlu1 %1689  ;;  %v1802_v21 = vmax.f32 %v1786_v34, 0.0  ;;  %v1797_v34 = vmax.f32 %v1781_v35, 0.0 }
 0x1a6   : > { %v1838_v47 = vrot.slane %v1809_v1, 4  ;;  %v3956_v4 = vsel %vm1814_vm3, %v1809_v1, %v1840_v10  ;;  %v1747_v11 = vmul.f32 %v3911_v36, %v1690_v52  ;;  %v1755_v61 = vmul.f32 %v3911_v36, %v1722_v56 }
 0x1a7   : > { %v1926_v16 = vrot.slane %v1802_v21, 4  ;;  %v1929_v8 = vsel %vm1814_vm3, %v1802_v21, %v1928_v19  ;;  %v1657_v1 = vmul.f32 %v3855_v49, %v3915_v23  ;;  %v1816_v52 = vrot.slane %v1797_v34, 4 }
 0x1a8   : > { %v1839_v38 = vsel %vm1814_vm3, %v1838_v47, %v1805_v43  ;;  %v1763_v9 = vadd.f32 %v1747_v11, %v3864_v39  ;;  %v1937_v3 = vperm.slane %v1929_v8, %v3948_v53  ;;  %v1674_v39 = vadd.f32 %v1658_v6, %v3881_v63 }
 0x1a9   : > { %v1927_v7 = vsel %vm1814_vm3, %v1926_v16, %v1798_v13  ;;  %v1826_v43 = vrot.slane %v1803_v57, 4  ;;  %v1678_v21 = vadd.f32 %v1662_v59, %v3901_v28  ;;  %v1673_v11 = vadd.f32 %v1657_v1, %v3834_v50 }
 0x1aa   : > { %v1783_v14 = vadd.f32 %v3924_v12, %v1763_v9  ;;  %v1933_v20 = vperm.slane %v1927_v7, %v3948_v53  ;;  %v1988_v60 = vrot.slane %v1937_v3, 4  ;;  %v3974_v24 = vsel %vm1814_vm3, %v1986_v31, %v1937_v3 }
 0x1ab   : > { %v1771_v41 = vadd.f32 %v1755_v61, %v1674_v39  ;;  %v2538_v6 = vmov 1934713408   ;;  %v1663_v9 = vmul.f32 %v3855_v49, %v3936_v55  ;;  %v1845_v25 = vperm.slane %v1839_v38, %v3948_v53 }
 0x1ac   : > { %v1799_v48 = vmax.f32 %v1783_v14, 0.0  ;;  %v3978_v22 = vsel %vm1814_vm3, %v1974_v42, %v1933_v20  ;;  %v1976_v5 = vrot.slane %v1933_v20, 4  ;;  %v3984_v44 = vsel %vm1814_vm3, %v1949_v58, %v1988_v60 }
 0x1ad   : > { %v1726_v32 = vpop.permute.xlu0 %1725  ;;  %v1698_v26 = vpop.permute.xlu1 %1697  ;;  %v1791_v62 = vadd.f32 %v3924_v12, %v1771_v41  ;;  %v1661_v58 = vmul.f32 %v3855_v49, %v3899_v18  ;;  %v1867_v16 = vunpack.c.l.s4 %v2538_v6  ;;  %v1849_v7 = vperm.slane %v3956_v4, %v3948_v53 }
 0x1ae   : > { %v1827_v63 = vsel %vm1814_vm3, %v1826_v43, %v1799_v48  ;;  %v1828_v13 = vrot.slane %v1799_v48, 4  ;;  %v1756_v29 = vmul.f32 %v3911_v36, %v1726_v32  ;;  %v1749_v51 = vmul.f32 %v3911_v36, %v1698_v26 }
 0x1af   : > { %v3991_v30 = vsel %vm1814_vm3, %v1945_v40, %v1976_v5  ;;  %v1833_v23 = vperm.slane %v1827_v63, %v3948_v53  ;;  %v1807_v8 = vmax.f32 %v1791_v62, 0.0  ;;  %v1677_v49 = vadd.f32 %v1661_v58, %v3890_v2 }
 0x1b0   : > { %v1829_v10 = vsel %vm1814_vm3, %v1803_v57, %v1828_v13  ;;  %v1765_v46 = vadd.f32 %v1749_v51, %v1668_v15  ;;  %v1772_v19 = vadd.f32 %v1756_v29, %v1675_v54  ;;  %v1679_v35 = vadd.f32 %v1663_v9, %v3852_v27 }
 0x1b1   : > { %v1837_v45 = vperm.slane %v1829_v10, %v3948_v53  ;;  %v1862_v20 = vrot.slane %v1833_v23, 4  ;;  %v1852_v55 = vrot.slane %v1807_v8, 4  ;;  %v4027_v26 = vunpack.c.0.s8 %v1867_v16 }
 0x1b2   : > { %v1785_v56 = vadd.f32 %v3924_v12, %v1765_v46  ;;  %v4009_v57 = vadd.f32 %v3924_v12, %v1772_v19  ;;  %v1900_v15 = vrot.slane %v1849_v7, 4  ;;  %v1888_v41 = vrot.slane %v1845_v25, 4 }
 0x1b3   : > { %v1874_v14 = vrot.slane %v1837_v45, 4 }
 0x1b4   : > { %v1801_v37 = vmax.f32 %v1785_v56, 0.0  ;;  %v1808_v39 = vmax.f32 %v4009_v57, 0.0 }
 0x1b5   : > { %v1718_v47 = vpop.permute.xlu0 %1717  ;;  %v1738_v40 = vpop.permute.xlu1 %1737 }
 0x1b6   : > { %v1759_v17 = vmul.f32 %v3911_v36, %v1738_v40  ;;  %v1813_v18 = vrot.slane %v1801_v37, 4  ;;  %v1817_v28 = vsel %vm1814_vm3, %v1801_v37, %v1816_v52  ;;  %v1754_v50 = vmul.f32 %v3911_v36, %v1718_v47 }
 0x1b7   : > { %v1825_v3 = vperm.slane %v1817_v28, %v3948_v53  ;;  %v1964_v29 = vrot.slane %v1808_v39, 4 }
 0x1b8   : > { %v1775_v0 = vadd.f32 %v1759_v17, %v1678_v21  ;;  %v1815_v31 = vsel %vm1814_vm3, %v1813_v18, %v1797_v34  ;;  %v1770_v38 = vadd.f32 %v1754_v50, %v1673_v11 }
 0x1b9   : > { %v1821_v60 = vperm.slane %v1815_v31, %v3948_v53  ;;  %v1876_v61 = vrot.slane %v1825_v3, 4  ;;  %v1875_v43 = vsel %vm1814_vm3, %v1874_v14, %v1825_v3 }
 0x1ba   : > { %v1795_v42 = vadd.f32 %v3924_v12, %v1775_v0  ;;  %v4036_v27 = vadd.f32 %v3924_v12, %v1770_v38  ;;  %v1881_v19 = vperm.slane %v1875_v43, %v4027_v26 }
 0x1bb   : > { %v1864_v33 = vrot.slane %v1821_v60, 4  ;;  %v1863_v4 = vsel %vm1814_vm3, %v1862_v20, %v1821_v60  ;;  %v1877_v5 = vsel %vm1814_vm3, %v1837_v45, %v1876_v61 }
 0x1bc   : > { %v1811_v48 = vmax.f32 %v1795_v42, 0.0  ;;  %v1885_v54 = vperm.slane %v1877_v5, %v4027_v26  ;;  %v1869_v52 = vperm.slane %v1863_v4, %v4027_v26  ;;  %v1920_v28 = vrot.slane %v1881_v19, 4 }
 0x1bd   : > { %v1742_v32 = vpop.permute.xlu1 %1741  ;;  %v1865_v10 = vsel %vm1814_vm3, %v1833_v23, %v1864_v33 }
 0x1be   : > { %v1850_v63 = vrot.slane %v1811_v48, 4  ;;  %v1853_v2 = vsel %vm1814_vm3, %v1811_v48, %v1852_v55  ;;  %v1760_v13 = vmul.f32 %v3911_v36, %v1742_v32  ;;  %v1873_v46 = vperm.slane %v1865_v10, %v4027_v26 }
 0x1bf   : > { %v1861_v51 = vperm.slane %v1853_v2, %v3948_v53  ;;  %v1924_v37 = vrot.slane %v1885_v54, 4  ;;  %v1912_v20 = vrot.slane %v1869_v52, 4 }
 0x1c0   : > { %v1851_v34 = vsel %vm1814_vm3, %v1850_v63, %v1807_v8  ;;  %v1776_v59 = vadd.f32 %v1760_v13, %v1679_v35  ;;  %v1916_v40 = vrot.slane %v1873_v46, 4  ;;  %v1806_v8 = vmax.f32 %v4036_v27, 0.0 }
 0x1c1   : > { %v1857_v1 = vperm.slane %v1851_v34, %v3948_v53  ;;  %v1901_v62 = vsel %vm1814_vm3, %v1861_v51, %v1900_v15  ;;  %v1898_v56 = vrot.slane %v1861_v51, 4  ;;  %v1981_v13 = vperm.slane %v3978_v22, %v4027_v26 }
 0x1c2   : > { %v1796_v58 = vadd.f32 %v3924_v12, %v1776_v59  ;;  %v1909_v21 = vperm.slane %v1901_v62, %v4027_v26  ;;  %v1997_v51 = vperm.slane %v3984_v44, %v4027_v26 }
 0x1c3   : > { %v1889_v47 = vsel %vm1814_vm3, %v1857_v1, %v1888_v41  ;;  %v1886_v45 = vrot.slane %v1857_v1, 4  ;;  %v1899_v11 = vsel %vm1814_vm3, %v1898_v56, %v1849_v7 }
 0x1c4   : > { %v1812_v23 = vmax.f32 %v1796_v58, 0.0  ;;  %v1897_v17 = vperm.slane %v1889_v47, %v4027_v26  ;;  %v1922_v6 = vrot.slane %v1909_v21, 4  ;;  %v1905_v16 = vperm.slane %v1899_v11, %v4027_v26 }
 0x1c5   : > { %v1734_v57 = vpop.permute.xlu1 %1733  ;;  %v1887_v18 = vsel %vm1814_vm3, %v1886_v45, %v1845_v25  ;;  %v4053_v9 = vsel %vm1814_vm3, %v1909_v21, %v1924_v37 }
 0x1c6   : > { %v1962_v3 = vrot.slane %v1812_v23, 4  ;;  %v1965_v50 = vsel %vm1814_vm3, %v1812_v23, %v1964_v29  ;;  %v1758_v0 = vmul.f32 %v3911_v36, %v1734_v57  ;;  %v1917_v7 = vsel %vm1814_vm3, %v1897_v17, %v1916_v40 }
 0x1c7   : > { %2047 = vrot.lane.b32.xlu0 %v1917_v7, %s2539_s14  ;;  %v1914_v31 = vrot.slane %v1897_v17, 4  ;;  %v1893_v14 = vperm.slane %v1887_v18, %v4027_v26  ;;  %v1923_v60 = vsel %vm1814_vm3, %v1922_v6, %v1885_v54  ;;  %v1921_v61 = vsel %vm1814_vm3, %v1905_v16, %v1920_v28  ;;  %s2552_s14 = smov 52  }
 0x1c8   : > { %v1963_v25 = vsel %vm1814_vm3, %v1962_v3, %v1808_v39  ;;  %v1774_v42 = vadd.f32 %v1758_v0, %v1677_v49  ;;  %v1918_v55 = vrot.slane %v1905_v16, 4  ;;  %v1973_v4 = vperm.slane %v1965_v50, %v3948_v53 }
 0x1c9   : > { %v1915_v43 = vsel %vm1814_vm3, %v1914_v31, %v1873_v46  ;;  %v1913_v36 = vsel %vm1814_vm3, %v1893_v14, %v1912_v20  ;;  %v1910_v48 = vrot.slane %v1893_v14, 4  ;;  %v1952_v39 = vrot.slane %v1806_v8, 4 }
 0x1ca   : > { %v1794_v38 = vadd.f32 %v3924_v12, %v1774_v42  ;;  %2043 = vrot.lane.b32.xlu2 %v1915_v43, %s2540_s17  ;;  %2039 = vrot.lane.b32.xlu1 %v1913_v36, %s2541_s18  ;;  %v1919_v33 = vsel %vm1814_vm3, %v1918_v55, %v1881_v19  ;;  %v1969_v32 = vperm.slane %v1963_v25, %v3948_v53  ;;  %v2010_v63 = vrot.slane %v1973_v4, 4  ;;  %s2553_s17 = smov 56   ;;  %s2306_s18 = sshll.u32 %s2519_s25, 1 }
 0x1cb   : > { %v4068_v35 = vsel %vm1814_vm3, %v1910_v48, %v1869_v52  ;;  %v1993_v12 = vperm.slane %v3974_v24, %v4027_v26  ;;  %v1985_v29 = vperm.slane %v3991_v30, %v4027_v26  ;;  %v2024_v46 = vrot.slane %v1981_v13, 4 }
 0x1cc   : > { %v1810_v49 = vmax.f32 %v1794_v38, 0.0  ;;  %v1998_v54 = vrot.slane %v1969_v32, 4  ;;  %v2036_v52 = vrot.slane %v1997_v51, 4 }
 0x1cd   : > { %v2032_v34 = vrot.slane %v1993_v12, 4  ;;  %v2028_v58 = vrot.slane %v1985_v29, 4 }
 0x1ce   : > { %v1950_v5 = vrot.slane %v1810_v49, 4  ;;  %v1953_v15 = vsel %vm1814_vm3, %v1810_v49, %v1952_v39 }
 0x1cf   : > { %v1961_v2 = vperm.slane %v1953_v15, %v3948_v53  ;;  %2059 = vrot.lane.b32.xlu0 %v1923_v60, %s2542_s20  ;;  %s359_s20 = sand.u32 1, %s2507_s22  }
 0x1d0   : > { %v1951_v41 = vsel %vm1814_vm3, %v1950_v5, %v1806_v8 }
 0x1d1   : > { %v1957_v10 = vperm.slane %v1951_v41, %v3948_v53  ;;  %v2011_v24 = vsel %vm1814_vm3, %v2010_v63, %v1961_v2  ;;  %v2012_v27 = vrot.slane %v1961_v2, 4 }
 0x1d2   : > { %2055 = vrot.lane.b32.xlu2 %v1921_v61, %s2543_s29  ;;  %2051 = vrot.lane.b32.xlu1 %v1919_v33, %s2544_s7  ;;  %v2017_v22 = vperm.slane %v2011_v24, %v4027_v26  ;;  %s2141_s29 = sadd.s32 %s2515_s24, %s2306_s18  ;;  %s2282_s7 = sshll.u32 %s359_s20, 3 }
 0x1d3   : > { %v1999_v59 = vsel %vm1814_vm3, %v1998_v54, %v1957_v10  ;;  %v2000_v30 = vrot.slane %v1957_v10, 4  ;;  %v2013_v1 = vsel %vm1814_vm3, %v1973_v4, %v2012_v27  ;;  %s361_s24 = scalar_lea.vmem [#allocation2], %s2282_s7 }
 0x1d4   : > { %v2005_v44 = vperm.slane %v1999_v59, %v4027_v26  ;;  %v2030_v53 = vrot.slane %v2017_v22, 4  ;;  %v2021_v62 = vperm.slane %v2013_v1, %v4027_v26  ;;  %v2033_v19 = vsel %vm1814_vm3, %v2017_v22, %v2032_v34  ;;  %s4109_s25 = sshll.u32 %s361_s24, 4  ;;  %s2146_s25 = int_to_ptr.vmem [resolvable:$true] %s4109_s25 }
 0x1d5   : > { %v2001_v56 = vsel %vm1814_vm3, %v1969_v32, %v2000_v30 }
 0x1d6   : > { %v2025_v21 = vsel %vm1814_vm3, %v2005_v44, %v2024_v46  ;;  %v2022_v37 = vrot.slane %v2005_v44, 4  ;;  %v2031_v47 = vsel %vm1814_vm3, %v2030_v53, %v1993_v12  ;;  %v2009_v40 = vperm.slane %v2001_v56, %v4027_v26 }
 0x1d7   : > { %2071 = vrot.lane.b32.xlu0 %v2025_v21, %s2545_s8  ;;  %v2037_v45 = vsel %vm1814_vm3, %v2021_v62, %v2036_v52  ;;  %v2034_v11 = vrot.slane %v2021_v62, 4  ;;  %s2307_s8 = sshll.u32 %s2141_s29, 3  ;;  %s2457_s29 = scalar_lea.hbm %s4158_s6, 32 }
 0x1d8   : > { %v2023_v23 = vsel %vm1814_vm3, %v2022_v37, %v1981_v13  ;;  %v2026_v17 = vrot.slane %v2009_v40, 4  ;;  %v2029_v6 = vsel %vm1814_vm3, %v2009_v40, %v2028_v58 }
 0x1d9   : > { %v2035_v16 = vsel %vm1814_vm3, %v2034_v11, %v1997_v51 }
 0x1da   : > { %2063 = vrot.lane.b32.xlu1 %v4053_v9, %s2546_s30  ;;  %2067 = vrot.lane.b32.xlu2 %v2023_v23, %s2547_s16  ;;  %v2027_v8 = vsel %vm1814_vm3, %v2026_v17, %v1985_v29  ;;  %vm2128_vm3 = vcmask 523264  }
 0x1df   : > { %2083 = vrot.lane.b32.xlu0 %v2031_v47, %s2548_s9  ;;  %s2143_s9 = scalar_lea.hbm %s4158_s6, %s2307_s8 }
 0x1e2   : > { %2075 = vrot.lane.b32.xlu1 %v2027_v8, %s2549_s12  ;;  %2079 = vrot.lane.b32.xlu2 %v2029_v6, %s2550_s13  ;;  %s2147_s12 = sshll.u32 %s2143_s9, 4  ;;  %s2131_s13 = scalar_lea.sflag [#allocation3], %s359_s20  ;;  %s2148_s12 = int_to_ptr.hbm [resolvable:$true] %s2147_s12 }
 0x1e7   : > { %2095 = vrot.lane.b32.xlu0 %v2037_v45, %s2551_s19  ;;  %s2451_s19 = sshra.s32 %s2148_s12, 4  ;;  %s2452_s19 = int_to_ptr.hbm [resolvable:$true] %s2451_s19 }
 0x1e8   : > { %p2458_p10 = scmp.lt.s32.totalorder %s2452_s19, %s4158_s6 }
 0x1ea   : > { %2087 = vrot.lane.b32.xlu1 %v2033_v19, %s2552_s14  ;;  %2091 = vrot.lane.b32.xlu2 %v2035_v16, %s2553_s17  ;;  %s2453_s14 = scalar_lea.hbm %s2452_s19, 8 }
 0x1eb   : > { %p2454_p6 = scmp.ne.s32.totalorder %s2452_s19, %s2453_s14  ;;  %p2459_p11 = scmp.lt.s32.totalorder %s2457_s29, %s2453_s14 }
 0x1ed   : > { %p2455_p7 = pnand %p2454_p6, %p2640_p3  ;;  %p2460_p12 = por %p2459_p11, %p2458_p10 }
 0x1ef   : > { %p2456_p9 = pneg %p2455_p7 }
 0x1f1   : > { %p2461_p13 = pnand %p2460_p12, %p2456_p9 }
 0x224   : > { %v2044_v26 = vpop.permute.xlu2 %2043 }
 0x22c   : > { %v2056_v28 = vpop.permute.xlu2 %2055 }
 0x234   : > { %v2068_v14 = vpop.permute.xlu2 %2067 }
 0x239   : > { %v2048_v57 = vpop.permute.xlu0 %2047 }
 0x23c   : > { %v2040_v18 = vpop.permute.xlu1 %2039  ;;  %v2080_v43 = vpop.permute.xlu2 %2079 }
 0x23d   : > { %v2099_v9 = vsel %vm2098_vm4, %v4068_v35, %v2040_v18 }
 0x23e   : > { %v2101_v50 = vsel %vm2100_vm5, %v2099_v9, %v2044_v26 }
 0x23f   : > { %v2103_v7 = vsel %vm2102_vm6, %v2101_v50, %v2048_v57 }
 0x241   : > { %v2060_v3 = vpop.permute.xlu0 %2059 }
 0x244   : > { %v2052_v0 = vpop.permute.xlu1 %2051  ;;  %v2092_v35 = vpop.permute.xlu2 %2091 }
 0x245   : > { %v2105_v31 = vsel %vm2104_vm7, %v2103_v7, %v2052_v0 }
 0x246   : > { %v2107_v60 = vsel %vm2106_vm8, %v2105_v31, %v2056_v28 }
 0x247   : > { %v2109_v42 = vsel %vm2108_vm9, %v2107_v60, %v2060_v3 }
 0x249   : > { %v2072_v20 = vpop.permute.xlu0 %2071 }
 0x24c   : > { %v2064_v25 = vpop.permute.xlu1 %2063 }
 0x24d   : > { %v2111_v61 = vsel %vm2110_vm10, %v2109_v42, %v2064_v25 }
 0x24e   : > { %v2113_v55 = vsel %vm2112_vm11, %v2111_v61, %v2068_v14 }
 0x24f   : > { %v2115_v48 = vsel %vm2114_vm12, %v2113_v55, %v2072_v20 }
 0x251   : > { %v2084_v36 = vpop.permute.xlu0 %2083 }
 0x254   : > { %v2076_v38 = vpop.permute.xlu1 %2075 }
 0x255   : > { %v2117_v33 = vsel %vm2116_vm13, %v2115_v48, %v2076_v38 }
 0x256   : > { %v2119_v4 = vsel %vm2118_vm14, %v2117_v33, %v2080_v43 }
 0x257   : > { %v2121_v39 = vsel %vm2120_vm15, %v2119_v4, %v2084_v36 }
 0x259   : > { %v2096_v5 = vpop.permute.xlu0 %2095 }
 0x25c   : > { %v2088_v49 = vpop.permute.xlu1 %2087 }
 0x25d   : > { %v2123_v32 = vsel %vm2122_vm0, %v2121_v39, %v2088_v49 }
 0x25e   : > { %v2125_v15 = vsel %vm2124_vm1, %v2123_v32, %v2092_v35 }
 0x25f   : > { %v2127_v12 = vsel %vm2126_vm2, %v2125_v15, %v2096_v5 }
 0x260   : > { %2129 = vst.msk [vmem:[%s361_s24] sm:$0xff] %vm2128_vm3, %v2127_v12 }
 0x261   : > { %2464 = shalt.err (!%p2461_p13)
}
 0x262   : > { %2320 = dma.vmem_to_hbm [thread:$0]  (%p2640_p3), %s2146_s25, 128, %s2148_s12, %s2131_s13  }
 0x263 PF: > { %p2326_p0 = scmp.ge.s32.totalorder %s2531_s28, 2  ;;  %s2159_s20 = sand.u32 1, %s2503_s21  }
 0x264   : > { %s2160_s30 = scalar_lea.sflag [#allocation3], %s2159_s20 }
 0x265   : > { %p2323_p1 = pnand %p2326_p0, %p2649_p8 }
 0x267   : > { %p2324_p2 = pneg %p2323_p1 }
 0x269   : > { %2498 = dma.done.wait (%p2324_p2), %s2160_s30, 128  }
 0x26a   : > { %2500 = vsyncadd (%p2324_p2), %s2160_s30, 4294967168  ;;  %s19_s28 = sadd.s32 1, %s2531_s28   ;;  %s4353_s10 = sld [smem:[#allocation5_spill]] }
 0x26b   : > { %p16_p4 = scmp.ge.s32.totalorder %s19_s28, 6   ;;  %s4354_s16 = sld [smem:[#allocation6_spill]] }
 0x26c   : > { %s4355_s21 = smov %s2507_s22  ;;  %s4356_s22 = smov %s2511_s23 }
 0x26d   : > { %s4357_s23 = smov %s2658_s15  ;;  %s4358_s24 = smov %s2523_s26 }
 0x26e   : > { %s4359_s25 = smov %s2527_s27  ;;  %18 = sbr.rel (!%p16_p4) target bundleno = 5 (0x5), region = 85 }
 0x270   : > { %s4360_s26 = smov %s4353_s10 }
 0x271   : > { %s4361_s27 = smov %s4354_s16 }
 0x273   :  { %2166 = vsyncpa [#allocation3], 1 }
 0x274   :  { %2168 = vsyncpa [#allocation3 + $0x1], 1 }

</bundles_post_ra>
